<compile_context>
chip_gen: v7x
topology: tpu7x:2x2x1
jax: 0.10.0
libtpu: 0.0.40
codegen_flags: <defaults>
</compile_context>

<pallas_src>
import jax
import jax.numpy as jnp
import numpy as np
from jax.experimental import pallas as pl
from jax.experimental.pallas import tpu as pltpu


def _sigmoid(v):
    # exp goes to the EUP; keep math in f32.
    return 1.0 / (1.0 + jnp.exp(-v))


def _regression_head_kernel(x_ref, w1_ref, b1_ref, w2_ref, b2_ref, w3_ref,
                            b3_ref, o_ref):
    # x_ref : (tile, D_pad)      w1_ref: (D_pad, 512)  b1_ref: (1, 512)
    # w2_ref: (512, 512)         b2_ref: (1, 512)
    # w3_ref: (512, 1)           b3_ref: (1, 1)
    # o_ref : (tile, 1)
    x = x_ref[...]

    h1 = jnp.dot(x, w1_ref[...], preferred_element_type=jnp.float32)
    h1 = _sigmoid(h1 + b1_ref[...])

    h2 = jnp.dot(h1, w2_ref[...], preferred_element_type=jnp.float32)
    h2 = _sigmoid(h2 + b2_ref[...])

    z = jnp.dot(h2, w3_ref[...], preferred_element_type=jnp.float32)
    o_ref[...] = (z + b3_ref[0, 0]).astype(o_ref.dtype)


def regression_head(x, params, *, row_tile=256):
    """x: (B, *shape_embedding); params = (w1, b1, w2, b2, w3, b3) torch layout."""
    w1, b1, w2, b2, w3, b3 = params
    B = x.shape[0]
    H = w1.shape[0]                       # 512
    xf = x.reshape(B, -1).astype(jnp.float32)
    D = xf.shape[1]

    # --- lane-pad the feature dim to a multiple of 128 (once, in the wrapper) ---
    D_pad = max(128, ((D + 127) // 128) * 128)
    w1t = jnp.transpose(w1).astype(jnp.float32)            # (D, H)
    if D_pad != D:
        xf = jnp.pad(xf, ((0, 0), (0, D_pad - D)))
        w1t = jnp.pad(w1t, ((0, D_pad - D), (0, 0)))
    w2t = jnp.transpose(w2).astype(jnp.float32)             # (H, H)
    w3t = jnp.transpose(w3).astype(jnp.float32)             # (H, 1)
    b1v = b1.reshape(1, H).astype(jnp.float32)
    b2v = b2.reshape(1, H).astype(jnp.float32)
    b3v = b3.reshape(1, 1).astype(jnp.float32)

    # --- row tiling: tile is a multiple of 8 and divides the padded batch ---
    tile = min(row_tile, max(8, ((B + 7) // 8) * 8))
    B_pad = ((B + tile - 1) // tile) * tile
    if B_pad != B:
        xf = jnp.pad(xf, ((0, B_pad - B), (0, 0)))
    grid = (B_pad // tile,)

    out = pl.pallas_call(
        _regression_head_kernel,
        out_shape=jax.ShapeDtypeStruct((B_pad, 1), jnp.float32),
        grid=grid,
        in_specs=[
            pl.BlockSpec((tile, D_pad), lambda i: (i, 0)),   # activations: tiled
            pl.BlockSpec((D_pad, H), lambda i: (0, 0)),      # weights: grid-invariant
            pl.BlockSpec((1, H), lambda i: (0, 0)),
            pl.BlockSpec((H, H), lambda i: (0, 0)),
            pl.BlockSpec((1, H), lambda i: (0, 0)),
            pl.BlockSpec((H, 1), lambda i: (0, 0)),
            pl.BlockSpec((1, 1), lambda i: (0, 0)),
        ],
        out_specs=pl.BlockSpec((tile, 1), lambda i: (i, 0)),
        compiler_params=pltpu.CompilerParams(
            dimension_semantics=("parallel",),
            vmem_limit_bytes=48 * 1024 * 1024,
        ),
    )(xf, w1t, b1v, w2t, b2v, w3t, b3v)

    return out[:B]


def _reference(x, params):
    """Pure-JAX reference matching the PyTorch module exactly."""
    w1, b1, w2, b2, w3, b3 = params
    xf = x.reshape(x.shape[0], -1)
    h = jax.nn.sigmoid(xf @ w1.T + b1)
    h = jax.nn.sigmoid(h @ w2.T + b2)
    return h @ w3.T + b3                  # (B, 1)


def _init_params(key, shape_embedding):
    """Deterministic synthetic parameters in torch nn.Linear layout (out, in)."""
    D = int(np.prod(shape_embedding))
    ks = jax.random.split(key, 6)
    w1 = jax.random.normal(ks[0], (512, D), jnp.float32) * 0.02
    b1 = jax.random.normal(ks[1], (512,), jnp.float32) * 0.02
    w2 = jax.random.normal(ks[2], (512, 512), jnp.float32) * 0.02
    b2 = jax.random.normal(ks[3], (512,), jnp.float32) * 0.02
    w3 = jax.random.normal(ks[4], (1, 512), jnp.float32) * 0.02
    b3 = jax.random.normal(ks[5], (1,), jnp.float32) * 0.02
    return (w1, b1, w2, b2, w3, b3)


if __name__ == "__main__":
    B = 2
    shape_embedding = (4, 16, 16)         # D = 1024
    key = jax.random.PRNGKey(0)
    k_x, k_p = jax.random.split(key)
    x = jax.random.normal(k_x, (B,) + shape_embedding, jnp.float32)
    params = _init_params(k_p, shape_embedding)

    out = jax.block_until_ready(regression_head(x, params))
    ref = jax.block_until_ready(_reference(x, params))

    np.testing.assert_allclose(np.asarray(out), np.asarray(ref),
                               rtol=1e-4, atol=1e-4)
    assert out.shape == (B, 1)
    print("KERNEL_OK")
</pallas_src>

<mosaic_0001>
module attributes {stable_mosaic.version = 11 : i64} {
  func.func @_regression_head_kernel(%arg0: i32, %arg1: memref<8x1024xf32, #tpu.memory_space<vmem>>, %arg2: memref<1024x512xf32, #tpu.memory_space<vmem>>, %arg3: memref<1x512xf32, #tpu.memory_space<vmem>>, %arg4: memref<512x512xf32, #tpu.memory_space<vmem>>, %arg5: memref<1x512xf32, #tpu.memory_space<vmem>>, %arg6: memref<512x1xf32, #tpu.memory_space<vmem>>, %arg7: memref<1x1xf32, #tpu.memory_space<vmem>>, %arg8: memref<8x1xf32, #tpu.memory_space<vmem>>) attributes {dimension_semantics = [#tpu.dimension_semantics<parallel>], iteration_bounds = array<i64: 1>, scalar_prefetch = 0 : i64, scratch_operands = 0 : i64, tpu.core_type = #tpu.core_type<tc>, window_params = [{transform_indices = @transform_0, window_bounds = array<i64: 8, 1024>}, {pipeline_mode = #tpu.pipeline_mode<synchronous>, transform_indices = @transform_1, window_bounds = array<i64: 1024, 512>}, {pipeline_mode = #tpu.pipeline_mode<synchronous>, transform_indices = @transform_2, window_bounds = array<i64: 1, 512>}, {pipeline_mode = #tpu.pipeline_mode<synchronous>, transform_indices = @transform_3, window_bounds = array<i64: 512, 512>}, {pipeline_mode = #tpu.pipeline_mode<synchronous>, transform_indices = @transform_4, window_bounds = array<i64: 1, 512>}, {pipeline_mode = #tpu.pipeline_mode<synchronous>, transform_indices = @transform_5, window_bounds = array<i64: 512, 1>}, {pipeline_mode = #tpu.pipeline_mode<synchronous>, transform_indices = @transform_6, window_bounds = array<i64: 1, 1>}, {transform_indices = @transform_7, window_bounds = array<i64: 8, 1>}]} {
    %c0 = arith.constant 0 : index
    %c0_0 = arith.constant 0 : index
    %0 = vector.load %arg1[%c0, %c0_0] : memref<8x1024xf32, #tpu.memory_space<vmem>>, vector<8x1024xf32>
    %c0_1 = arith.constant 0 : index
    %c0_2 = arith.constant 0 : index
    %1 = vector.load %arg2[%c0_1, %c0_2] : memref<1024x512xf32, #tpu.memory_space<vmem>>, vector<1024x512xf32>
    %cst = arith.constant dense<0.000000e+00> : vector<8x512xf32>
    %2 = tpu.matmul %0, %1, %cst {dimension_numbers = #tpu.dot_dimension_numbers<[1], [0], [0], [1], [0, 0, 1, 1], [], []>} : vector<8x1024xf32>, vector<1024x512xf32>, vector<8x512xf32> -> vector<8x512xf32>
    %c0_3 = arith.constant 0 : index
    %c0_4 = arith.constant 0 : index
    %3 = vector.load %arg3[%c0_3, %c0_4] : memref<1x512xf32, #tpu.memory_space<vmem>>, vector<1x512xf32>
    %4 = vector.broadcast %3 : vector<1x512xf32> to vector<8x512xf32>
    %5 = arith.addf %2, %4 : vector<8x512xf32>
    %cst_5 = arith.constant 0.000000e+00 : f32
    %6 = vector.broadcast %cst_5 : f32 to vector<8x512xf32>
    %7 = arith.subf %6, %5 : vector<8x512xf32>
    %8 = math.exp %7 : vector<8x512xf32>
    %cst_6 = arith.constant 1.000000e+00 : f32
    %9 = vector.broadcast %cst_6 : f32 to vector<8x512xf32>
    %10 = arith.addf %9, %8 : vector<8x512xf32>
    %cst_7 = arith.constant 1.000000e+00 : f32
    %11 = vector.broadcast %cst_7 : f32 to vector<8x512xf32>
    %12 = arith.divf %11, %10 : vector<8x512xf32>
    %c0_8 = arith.constant 0 : index
    %c0_9 = arith.constant 0 : index
    %13 = vector.load %arg4[%c0_8, %c0_9] : memref<512x512xf32, #tpu.memory_space<vmem>>, vector<512x512xf32>
    %cst_10 = arith.constant dense<0.000000e+00> : vector<8x512xf32>
    %14 = tpu.matmul %12, %13, %cst_10 {dimension_numbers = #tpu.dot_dimension_numbers<[1], [0], [0], [1], [0, 0, 1, 1], [], []>} : vector<8x512xf32>, vector<512x512xf32>, vector<8x512xf32> -> vector<8x512xf32>
    %c0_11 = arith.constant 0 : index
    %c0_12 = arith.constant 0 : index
    %15 = vector.load %arg5[%c0_11, %c0_12] : memref<1x512xf32, #tpu.memory_space<vmem>>, vector<1x512xf32>
    %16 = vector.broadcast %15 : vector<1x512xf32> to vector<8x512xf32>
    %17 = arith.addf %14, %16 : vector<8x512xf32>
    %cst_13 = arith.constant 0.000000e+00 : f32
    %18 = vector.broadcast %cst_13 : f32 to vector<8x512xf32>
    %19 = arith.subf %18, %17 : vector<8x512xf32>
    %20 = math.exp %19 : vector<8x512xf32>
    %cst_14 = arith.constant 1.000000e+00 : f32
    %21 = vector.broadcast %cst_14 : f32 to vector<8x512xf32>
    %22 = arith.addf %21, %20 : vector<8x512xf32>
    %cst_15 = arith.constant 1.000000e+00 : f32
    %23 = vector.broadcast %cst_15 : f32 to vector<8x512xf32>
    %24 = arith.divf %23, %22 : vector<8x512xf32>
    %c0_16 = arith.constant 0 : index
    %c0_17 = arith.constant 0 : index
    %25 = vector.load %arg6[%c0_16, %c0_17] : memref<512x1xf32, #tpu.memory_space<vmem>>, vector<512x1xf32>
    %cst_18 = arith.constant dense<0.000000e+00> : vector<8x1xf32>
    %26 = tpu.matmul %24, %25, %cst_18 {dimension_numbers = #tpu.dot_dimension_numbers<[1], [0], [0], [1], [0, 0, 1, 1], [], []>} : vector<8x512xf32>, vector<512x1xf32>, vector<8x1xf32> -> vector<8x1xf32>
    %c0_19 = arith.constant 0 : index
    %c0_20 = arith.constant 0 : index
    %27 = vector.load %arg7[%c0_19, %c0_20] : memref<1x1xf32, #tpu.memory_space<vmem>>, vector<1x1xf32>
    %28 = vector.extract %27[0, 0] : f32 from vector<1x1xf32>
    %29 = vector.broadcast %28 : f32 to vector<8x1xf32>
    %30 = arith.addf %26, %29 : vector<8x1xf32>
    %c0_21 = arith.constant 0 : index
    %c0_22 = arith.constant 0 : index
    %31 = vector.load %arg8[%c0_21, %c0_22] : memref<8x1xf32, #tpu.memory_space<vmem>>, vector<8x1xf32>
    tpu.vector_store %arg8[%c0_21, %c0_22], %30 {strides = array<i32>} : memref<8x1xf32, #tpu.memory_space<vmem>>, vector<8x1xf32>,
    return
  }
  func.func @transform_0(%arg0: i32) -> (i32, i32) {
    %c0_i32 = arith.constant 0 : i32
    %c0_i32_0 = arith.constant 0 : i32
    return %arg0, %c0_i32 : i32, i32
  }
  func.func @transform_1(%arg0: i32) -> (i32, i32) {
    %c0_i32 = arith.constant 0 : i32
    %c0_i32_0 = arith.constant 0 : i32
    %c0_i32_1 = arith.constant 0 : i32
    return %c0_i32, %c0_i32_0 : i32, i32
  }
  func.func @transform_2(%arg0: i32) -> (i32, i32) {
    %c0_i32 = arith.constant 0 : i32
    %c0_i32_0 = arith.constant 0 : i32
    %c0_i32_1 = arith.constant 0 : i32
    return %c0_i32, %c0_i32_0 : i32, i32
  }
  func.func @transform_3(%arg0: i32) -> (i32, i32) {
    %c0_i32 = arith.constant 0 : i32
    %c0_i32_0 = arith.constant 0 : i32
    %c0_i32_1 = arith.constant 0 : i32
    return %c0_i32, %c0_i32_0 : i32, i32
  }
  func.func @transform_4(%arg0: i32) -> (i32, i32) {
    %c0_i32 = arith.constant 0 : i32
    %c0_i32_0 = arith.constant 0 : i32
    %c0_i32_1 = arith.constant 0 : i32
    return %c0_i32, %c0_i32_0 : i32, i32
  }
  func.func @transform_5(%arg0: i32) -> (i32, i32) {
    %c0_i32 = arith.constant 0 : i32
    %c0_i32_0 = arith.constant 0 : i32
    %c0_i32_1 = arith.constant 0 : i32
    return %c0_i32, %c0_i32_0 : i32, i32
  }
  func.func @transform_6(%arg0: i32) -> (i32, i32) {
    %c0_i32 = arith.constant 0 : i32
    %c0_i32_0 = arith.constant 0 : i32
    %c0_i32_1 = arith.constant 0 : i32
    return %c0_i32, %c0_i32_0 : i32, i32
  }
  func.func @transform_7(%arg0: i32) -> (i32, i32) {
    %c0_i32 = arith.constant 0 : i32
    %c0_i32_0 = arith.constant 0 : i32
    return %arg0, %c0_i32 : i32, i32
  }
}

</mosaic_0001>

<bundles_post_ra>
// kernel: tpu_custom_call.1
= control target key start
LH: loop header
LB: loop body
LE: loop exit
PB: predicated region body
PF: predicated region fallthrough
CT: control target
= control target key end

     0   :  { %s3445_s0 = inlined_call_operand.hbm [shape: f32[8,1024], index: 0, kind: input, shape index: {}]   ;;  %s3446_s1 = inlined_call_operand.hbm [shape: f32[1024,512], index: 1, kind: input, shape index: {}]   ;;  %s3447_s2 = inlined_call_operand.hbm [shape: f32[1,512], index: 2, kind: input, shape index: {}]   ;;  %s3448_s3 = inlined_call_operand.hbm [shape: f32[512,512], index: 3, kind: input, shape index: {}]   ;;  %s3449_s4 = inlined_call_operand.hbm [shape: f32[1,512], index: 4, kind: input, shape index: {}]   ;;  %s3450_s5 = inlined_call_operand.vmem [shape: f32[512,1], index: 5, kind: input, shape index: {}]   ;;  %s3451_s6 = inlined_call_operand.<no memory space> [shape: f32[1,1], index: 6, kind: input, shape index: {}]   ;;  %s3452_s7 = inlined_call_operand.vmem [shape: f32[8,1], index: 7, kind: output, shape index: {}]  }
   0x1   :  { %v12_v0 = vstv %s3451_s6 }
   0x2   :  { %13 = vst [vmem:[#allocation2] sm:$0x1] %v12_v0 }
   0x3   :  { %14 = vsyncpa [#allocation4], 0 }
   0x4   :  { %15 = vsyncpa [#allocation6], 0 }
   0x5   :  { %16 = vsyncpa [#allocation9], 0  ;;  %s3109_s26 = smov [#allocation5]   ;;  %s2993_s30 = scalar_lea.hbm %s3446_s1, 65536 }
   0x6   :  { %s32_s27 = sshll.u32 %s3109_s26, 4  ;;  %p2994_p0 = scmp.ne.s32.totalorder %s3446_s1, %s2993_s30  ;;  %s33_s27 = int_to_ptr.vmem [resolvable:$true] %s32_s27 }
   0x7   :  { %p2997_p1 = scmp.lt.u32.totalorder %s2993_s30, %s3446_s1 }
   0x9   :  { %p2999_p2 = pnand %p2997_p1, %p2994_p0 }
   0xb   :  { %3002 = shalt.err (!%p2999_p2)
}
   0xc   :  { %s3003_s6 = scalar_lea.vmem %s33_s27, 65536  ;;  %p3008_p4 = scmp.lt.s32.totalorder %s33_s27, %s33_s27 }
   0xd   :  { %p3004_p3 = scmp.ne.s32.totalorder %s33_s27, %s3003_s6  ;;  %p3009_p5 = scmp.lt.s32.totalorder %s3003_s6, %s3003_s6 }
   0xf   :  { %p3010_p6 = por %p3009_p5, %p3008_p4 }
  0x11   :  { %p3011_p7 = pnand %p3010_p6, %p3004_p3 }
  0x13   :  { %3014 = shalt.err (!%p3011_p7)
}
  0x14   :  { %s3110_s12 = smov 512   ;;  %s3111_s13 = smov 32  }
  0x15   :  { %38 = dma.hbm_to_vmem [thread:$0]  %s3446_s1, 65536, %s33_s27, [#allocation6], %s3110_s12, %s3110_s12, %s3111_s13  }
  0x16   :  { %s3112_s16 = smov [#allocation8]   ;;  %s3113_s18 = smov [#allocation3]  }
  0x17   :  { %s54_s17 = sshll.u32 %s3112_s16, 4  ;;  %s23_s19 = sshll.u32 %s3113_s18, 4  ;;  %s55_s17 = int_to_ptr.vmem [resolvable:$true] %s54_s17  ;;  %s24_s19 = int_to_ptr.vmem [resolvable:$true] %s23_s19 }
  0x18   :  { %s3015_s22 = scalar_lea.hbm %s3448_s3, 32768 }
  0x19   :  { %p3016_p8 = scmp.ne.s32.totalorder %s3448_s3, %s3015_s22  ;;  %p3019_p9 = scmp.lt.u32.totalorder %s3015_s22, %s3448_s3 }
  0x1b   :  { %p3021_p10 = pnand %p3019_p9, %p3016_p8 }
  0x1d   :  { %3024 = shalt.err (!%p3021_p10)
}
  0x1e   :  { %s3025_s1 = scalar_lea.vmem %s55_s17, 32768  ;;  %p3030_p12 = scmp.lt.s32.totalorder %s55_s17, %s55_s17 }
  0x1f   :  { %p3026_p11 = scmp.ne.s32.totalorder %s55_s17, %s3025_s1  ;;  %p3031_p13 = scmp.lt.s32.totalorder %s3025_s1, %s3025_s1 }
  0x21   :  { %p3032_p0 = por %p3031_p13, %p3030_p12 }
  0x23   :  { %p3033_p1 = pnand %p3032_p0, %p3026_p11 }
  0x25   :  { %3036 = shalt.err (!%p3033_p1)
}
  0x26   :  { %60 = dma.hbm_to_vmem [thread:$0]  %s3448_s3, 32768, %s55_s17, [#allocation9], %s3110_s12, %s3110_s12, %s3111_s13  }
  0x27   :  { %s3037_s8 = scalar_lea.hbm %s3445_s0, 1024 }
  0x28   :  { %p3038_p2 = scmp.ne.s32.totalorder %s3445_s0, %s3037_s8  ;;  %p3041_p3 = scmp.lt.u32.totalorder %s3037_s8, %s3445_s0 }
  0x2a   :  { %p3043_p4 = pnand %p3041_p3, %p3038_p2 }
  0x2c   :  { %3046 = shalt.err (!%p3043_p4)
}
  0x2d   :  { %s3047_s14 = scalar_lea.vmem %s24_s19, 1024  ;;  %p3052_p6 = scmp.lt.s32.totalorder %s24_s19, %s24_s19 }
  0x2e   :  { %p3048_p5 = scmp.ne.s32.totalorder %s24_s19, %s3047_s14  ;;  %p3053_p7 = scmp.lt.s32.totalorder %s3047_s14, %s3047_s14 }
  0x30   :  { %p3054_p8 = por %p3053_p7, %p3052_p6 }
  0x32   :  { %p3055_p9 = pnand %p3054_p8, %p3048_p5 }
  0x34   :  { %3058 = shalt.err (!%p3055_p9)
}
  0x35   :  { %26 = dma.hbm_to_vmem [thread:$0]  %s3445_s0, 1024, %s24_s19, [#allocation4]  }
  0x36   :  { %s3114_s13 = smov [#allocation7]   ;;  %s3115_s16 = smov [#allocation10]  }
  0x37   :  { %s45_s15 = sshll.u32 %s3114_s13, 4  ;;  %s67_s17 = sshll.u32 %s3115_s16, 4  ;;  %s46_s15 = int_to_ptr.vmem [resolvable:$true] %s45_s15  ;;  %s68_s17 = int_to_ptr.vmem [resolvable:$true] %s67_s17 }
  0x38   :  { %s3059_s21 = scalar_lea.hbm %s3447_s2, 64 }
  0x39   :  { %p3060_p10 = scmp.ne.s32.totalorder %s3447_s2, %s3059_s21  ;;  %p3063_p11 = scmp.lt.u32.totalorder %s3059_s21, %s3447_s2 }
  0x3b   :  { %p3065_p12 = pnand %p3063_p11, %p3060_p10 }
  0x3d   :  { %3068 = shalt.err (!%p3065_p12)
}
  0x3e   :  { %s3069_s0 = scalar_lea.vmem %s46_s15, 64  ;;  %p3074_p0 = scmp.lt.s32.totalorder %s46_s15, %s46_s15 }
  0x3f   :  { %p3070_p13 = scmp.ne.s32.totalorder %s46_s15, %s3069_s0  ;;  %p3075_p1 = scmp.lt.s32.totalorder %s3069_s0, %s3069_s0 }
  0x41   :  { %p3076_p2 = por %p3075_p1, %p3074_p0 }
  0x43   :  { %p3077_p3 = pnand %p3076_p2, %p3070_p13 }
  0x45   :  { %3080 = shalt.err (!%p3077_p3)
}
  0x46   :  { %48 = dma.hbm_to_vmem [thread:$0]  %s3447_s2, 64, %s46_s15, [#allocation6]  }
  0x47   :  { %s3081_s28 = scalar_lea.hbm %s3449_s4, 64 }
  0x48   :  { %p3082_p4 = scmp.ne.s32.totalorder %s3449_s4, %s3081_s28  ;;  %p3085_p5 = scmp.lt.u32.totalorder %s3081_s28, %s3449_s4 }
  0x4a   :  { %p3087_p6 = pnand %p3085_p5, %p3082_p4 }
  0x4c   :  { %3090 = shalt.err (!%p3087_p6)
}
  0x4d   :  { %s3091_s10 = scalar_lea.vmem %s68_s17, 64  ;;  %p3096_p8 = scmp.lt.s32.totalorder %s68_s17, %s68_s17 }
  0x4e   :  { %p3092_p7 = scmp.ne.s32.totalorder %s68_s17, %s3091_s10  ;;  %p3097_p9 = scmp.lt.s32.totalorder %s3091_s10, %s3091_s10 }
  0x50   :  { %p3098_p10 = por %p3097_p9, %p3096_p8 }
  0x52   :  { %p3099_p11 = pnand %p3098_p10, %p3092_p7 }
  0x54   :  { %3102 = shalt.err (!%p3099_p11)
}
  0x55   :  { %70 = dma.hbm_to_vmem [thread:$0]  %s3449_s4, 64, %s68_s17, [#allocation9]  }
  0x56   :  { %3103 = dma.done.wait [#allocation4], 1024  }
  0x57   :  { %3104 = vsyncadd [#allocation4], 4294966272 }
  0x58   :  { %3105 = dma.done.wait [#allocation6], 65600  }
  0x59   :  { %3106 = vsyncadd [#allocation6], 4294901696 }
  0x5a   :  { %3107 = dma.done.wait [#allocation9], 32832  }
  0x5b   :  { %3108 = vsyncadd [#allocation9], 4294934464  ;;  %v99_v1 = vld [vmem:[#allocation5 + $0x8] sm:$0xff]  ;;  %v101_v3 = vld [vmem:[#allocation5 + $0x18] sm:$0xff]  ;;  %vm2017_vm0 = vcmask 7168  }
  0x5c   :  { %v103_v2 = vld [vmem:[#allocation5 + $0x28] sm:$0xff]  ;;  %v105_v5 = vld [vmem:[#allocation5 + $0x38] sm:$0xff]  ;;  %v98_v6 = vld [vmem:[#allocation5] sm:$0xff] }
  0x5d   :  { %v2096_v4 = vpack.c.bf16 %v103_v2, %v99_v1  ;;  %v102_v7 = vld [vmem:[#allocation5 + $0x20] sm:$0xff]  ;;  %v2352_v8 = vpack.c.bf16 %v105_v5, %v101_v3  ;;  %v100_v10 = vld [vmem:[#allocation5 + $0x10] sm:$0xff]  ;;  %v107_v12 = vld [vmem:[#allocation5 + $0x48] sm:$0xff] }
  0x5e   :  { %v2098_v9 = vpack.c.bf16 %v102_v7, %v98_v6  ;;  %v104_v11 = vld [vmem:[#allocation5 + $0x30] sm:$0xff]  ;;  %v111_v14 = vld [vmem:[#allocation5 + $0x68] sm:$0xff]  ;;  %v109_v15 = vld [vmem:[#allocation5 + $0x58] sm:$0xff] }
  0x5f   :  { %2097 = vmatprep.subr.bf16.mxu0 %v2096_v4  ;;  %v2354_v13 = vpack.c.bf16 %v104_v11, %v100_v10  ;;  %v113_v16 = vld [vmem:[#allocation5 + $0x78] sm:$0xff]  ;;  %2353 = vmatprep.subr.bf16.mxu1 %v2352_v8  ;;  %v2100_v17 = vpack.c.bf16 %v111_v14, %v107_v12  ;;  %v106_v19 = vld [vmem:[#allocation5 + $0x40] sm:$0xff]  ;;  %v108_v21 = vld [vmem:[#allocation5 + $0x50] sm:$0xff] }
  0x60   :  { %2099 = vmatpush1.bf16.msra.mxu0 %v2098_v9  ;;  %v2356_v18 = vpack.c.bf16 %v113_v16, %v109_v15  ;;  %v110_v20 = vld [vmem:[#allocation5 + $0x60] sm:$0xff]  ;;  %v112_v23 = vld [vmem:[#allocation5 + $0x70] sm:$0xff]  ;;  %v115_v24 = vld [vmem:[#allocation5 + $0x88] sm:$0xff] }
  0x61   :  { %2355 = vmatpush1.bf16.msra.mxu1 %v2354_v13  ;;  %v2102_v22 = vpack.c.bf16 %v110_v20, %v106_v19  ;;  %v119_v25 = vld [vmem:[#allocation5 + $0xa8] sm:$0xff]  ;;  %2101 = vmatprep.subr.bf16.mxu0 %v2100_v17  ;;  %v2358_v26 = vpack.c.bf16 %v112_v23, %v108_v21  ;;  %v117_v28 = vld [vmem:[#allocation5 + $0x98] sm:$0xff]  ;;  %v114_v30 = vld [vmem:[#allocation5 + $0x80] sm:$0xff] }
  0x62   :  { %2357 = vmatprep.subr.bf16.mxu1 %v2356_v18  ;;  %v2104_v27 = vpack.c.bf16 %v119_v25, %v115_v24  ;;  %v121_v29 = vld [vmem:[#allocation5 + $0xb8] sm:$0xff]  ;;  %v118_v32 = vld [vmem:[#allocation5 + $0xa0] sm:$0xff]  ;;  %v116_v33 = vld [vmem:[#allocation5 + $0x90] sm:$0xff] }
  0x63   :  { %v2360_v31 = vpack.c.bf16 %v121_v29, %v117_v28  ;;  %v120_v34 = vld [vmem:[#allocation5 + $0xb0] sm:$0xff]  ;;  %v2106_v35 = vpack.c.bf16 %v118_v32, %v114_v30  ;;  %v123_v36 = vld [vmem:[#allocation5 + $0xc8] sm:$0xff]  ;;  %v125_v38 = vld [vmem:[#allocation5 + $0xd8] sm:$0xff] }
  0x64   :  { %2103 = vmatpush1.bf16.msra.mxu0 %v2102_v22  ;;  %v127_v37 = vld [vmem:[#allocation5 + $0xe8] sm:$0xff]  ;;  %v2362_v39 = vpack.c.bf16 %v120_v34, %v116_v33  ;;  %v129_v41 = vld [vmem:[#allocation5 + $0xf8] sm:$0xff]  ;;  %v122_v42 = vld [vmem:[#allocation5 + $0xc0] sm:$0xff] }
  0x65   :  { %2359 = vmatpush1.bf16.msra.mxu1 %v2358_v26  ;;  %2105 = vmatprep.subr.bf16.mxu0 %v2104_v27  ;;  %v2108_v40 = vpack.c.bf16 %v127_v37, %v123_v36  ;;  %v126_v43 = vld [vmem:[#allocation5 + $0xe0] sm:$0xff]  ;;  %v2364_v44 = vpack.c.bf16 %v129_v41, %v125_v38  ;;  %v124_v45 = vld [vmem:[#allocation5 + $0xd0] sm:$0xff]  ;;  %v131_v47 = vld [vmem:[#allocation5 + $0x108] sm:$0xff] }
  0x66   :  { %2361 = vmatprep.subr.bf16.mxu1 %v2360_v31  ;;  %v128_v46 = vld [vmem:[#allocation5 + $0xf0] sm:$0xff]  ;;  %v135_v48 = vld [vmem:[#allocation5 + $0x128] sm:$0xff]  ;;  %v133_v49 = vld [vmem:[#allocation5 + $0x118] sm:$0xff]  ;;  %v2110_v51 = vpack.c.bf16 %v126_v43, %v122_v42 }
  0x67   :  { %v137_v50 = vld [vmem:[#allocation5 + $0x138] sm:$0xff]  ;;  %v2366_v52 = vpack.c.bf16 %v128_v46, %v124_v45  ;;  %v2112_v53 = vpack.c.bf16 %v135_v48, %v131_v47  ;;  %v130_v54 = vld [vmem:[#allocation5 + $0x100] sm:$0xff]  ;;  %v132_v56 = vld [vmem:[#allocation5 + $0x110] sm:$0xff] }
  0x68   :  { %2107 = vmatpush1.bf16.msra.mxu0 %v2106_v35  ;;  %v134_v55 = vld [vmem:[#allocation5 + $0x120] sm:$0xff]  ;;  %v2368_v57 = vpack.c.bf16 %v137_v50, %v133_v49  ;;  %v136_v58 = vld [vmem:[#allocation5 + $0x130] sm:$0xff]  ;;  %v139_v59 = vld [vmem:[#allocation5 + $0x148] sm:$0xff] }
  0x69   :  { %2363 = vmatpush1.bf16.msra.mxu1 %v2362_v39  ;;  %2109 = vmatprep.subr.bf16.mxu0 %v2108_v40  ;;  %v143_v60 = vld [vmem:[#allocation5 + $0x168] sm:$0xff]  ;;  %v141_v61 = vld [vmem:[#allocation5 + $0x158] sm:$0xff]  ;;  %v2114_v63 = vpack.c.bf16 %v134_v55, %v130_v54  ;;  %v2370_v0 = vpack.c.bf16 %v136_v58, %v132_v56  ;;  %v138_v2 = vld [vmem:[#allocation5 + $0x140] sm:$0xff] }
  0x6a   :  { %2365 = vmatprep.subr.bf16.mxu1 %v2364_v44  ;;  %v145_v62 = vld [vmem:[#allocation5 + $0x178] sm:$0xff]  ;;  %v2116_v1 = vpack.c.bf16 %v143_v60, %v139_v59  ;;  %v142_v3 = vld [vmem:[#allocation5 + $0x160] sm:$0xff]  ;;  %v140_v4 = vld [vmem:[#allocation5 + $0x150] sm:$0xff] }
  0x6b   :  { %v2372_v5 = vpack.c.bf16 %v145_v62, %v141_v61  ;;  %v144_v6 = vld [vmem:[#allocation5 + $0x170] sm:$0xff]  ;;  %v147_v7 = vld [vmem:[#allocation5 + $0x188] sm:$0xff]  ;;  %v149_v9 = vld [vmem:[#allocation5 + $0x198] sm:$0xff]  ;;  %v2118_v11 = vpack.c.bf16 %v142_v3, %v138_v2 }
  0x6c   :  { %2111 = vmatpush1.bf16.msra.mxu0 %v2110_v51  ;;  %v151_v8 = vld [vmem:[#allocation5 + $0x1a8] sm:$0xff]  ;;  %v153_v10 = vld [vmem:[#allocation5 + $0x1b8] sm:$0xff]  ;;  %v2374_v12 = vpack.c.bf16 %v144_v6, %v140_v4  ;;  %v146_v14 = vld [vmem:[#allocation5 + $0x180] sm:$0xff] }
  0x6d   :  { %2367 = vmatpush1.bf16.msra.mxu1 %v2366_v52  ;;  %2113 = vmatprep.subr.bf16.mxu0 %v2112_v53  ;;  %v2120_v13 = vpack.c.bf16 %v151_v8, %v147_v7  ;;  %v150_v15 = vld [vmem:[#allocation5 + $0x1a0] sm:$0xff]  ;;  %v148_v16 = vld [vmem:[#allocation5 + $0x190] sm:$0xff]  ;;  %v2376_v17 = vpack.c.bf16 %v153_v10, %v149_v9  ;;  %v155_v19 = vld [vmem:[#allocation5 + $0x1c8] sm:$0xff] }
  0x6e   :  { %2369 = vmatprep.subr.bf16.mxu1 %v2368_v57  ;;  %v152_v18 = vld [vmem:[#allocation5 + $0x1b0] sm:$0xff]  ;;  %v159_v20 = vld [vmem:[#allocation5 + $0x1e8] sm:$0xff]  ;;  %v157_v21 = vld [vmem:[#allocation5 + $0x1d8] sm:$0xff]  ;;  %v2122_v23 = vpack.c.bf16 %v150_v15, %v146_v14 }
  0x6f   :  { %v161_v22 = vld [vmem:[#allocation5 + $0x1f8] sm:$0xff]  ;;  %v2378_v24 = vpack.c.bf16 %v152_v18, %v148_v16  ;;  %v2124_v25 = vpack.c.bf16 %v159_v20, %v155_v19  ;;  %v154_v26 = vld [vmem:[#allocation5 + $0x1c0] sm:$0xff]  ;;  %v156_v28 = vld [vmem:[#allocation5 + $0x1d0] sm:$0xff] }
  0x70   :  { %2115 = vmatpush1.bf16.msra.mxu0 %v2114_v63  ;;  %v158_v27 = vld [vmem:[#allocation5 + $0x1e0] sm:$0xff]  ;;  %v2380_v29 = vpack.c.bf16 %v161_v22, %v157_v21  ;;  %v160_v30 = vld [vmem:[#allocation5 + $0x1f0] sm:$0xff]  ;;  %v163_v31 = vld [vmem:[#allocation5 + $0x208] sm:$0xff] }
  0x71   :  { %2371 = vmatpush1.bf16.msra.mxu1 %v2370_v0  ;;  %2117 = vmatprep.subr.bf16.mxu0 %v2116_v1  ;;  %v167_v32 = vld [vmem:[#allocation5 + $0x228] sm:$0xff]  ;;  %v165_v33 = vld [vmem:[#allocation5 + $0x218] sm:$0xff]  ;;  %v2126_v35 = vpack.c.bf16 %v158_v27, %v154_v26  ;;  %v2382_v36 = vpack.c.bf16 %v160_v30, %v156_v28  ;;  %v162_v38 = vld [vmem:[#allocation5 + $0x200] sm:$0xff] }
  0x72   :  { %2373 = vmatprep.subr.bf16.mxu1 %v2372_v5  ;;  %v169_v34 = vld [vmem:[#allocation5 + $0x238] sm:$0xff]  ;;  %v2128_v37 = vpack.c.bf16 %v167_v32, %v163_v31  ;;  %v166_v39 = vld [vmem:[#allocation5 + $0x220] sm:$0xff]  ;;  %v164_v40 = vld [vmem:[#allocation5 + $0x210] sm:$0xff] }
  0x73   :  { %v2384_v41 = vpack.c.bf16 %v169_v34, %v165_v33  ;;  %v168_v42 = vld [vmem:[#allocation5 + $0x230] sm:$0xff]  ;;  %v171_v43 = vld [vmem:[#allocation5 + $0x248] sm:$0xff]  ;;  %v173_v45 = vld [vmem:[#allocation5 + $0x258] sm:$0xff]  ;;  %v2130_v47 = vpack.c.bf16 %v166_v39, %v162_v38 }
  0x74   :  { %2119 = vmatpush1.bf16.msra.mxu0 %v2118_v11  ;;  %v175_v44 = vld [vmem:[#allocation5 + $0x268] sm:$0xff]  ;;  %v177_v46 = vld [vmem:[#allocation5 + $0x278] sm:$0xff]  ;;  %v2386_v48 = vpack.c.bf16 %v168_v42, %v164_v40  ;;  %v170_v50 = vld [vmem:[#allocation5 + $0x240] sm:$0xff] }
  0x75   :  { %2375 = vmatpush1.bf16.msra.mxu1 %v2374_v12  ;;  %2121 = vmatprep.subr.bf16.mxu0 %v2120_v13  ;;  %v2132_v49 = vpack.c.bf16 %v175_v44, %v171_v43  ;;  %v174_v51 = vld [vmem:[#allocation5 + $0x260] sm:$0xff]  ;;  %v172_v52 = vld [vmem:[#allocation5 + $0x250] sm:$0xff]  ;;  %v2388_v53 = vpack.c.bf16 %v177_v46, %v173_v45  ;;  %v179_v55 = vld [vmem:[#allocation5 + $0x288] sm:$0xff] }
  0x76   :  { %2377 = vmatprep.subr.bf16.mxu1 %v2376_v17  ;;  %v176_v54 = vld [vmem:[#allocation5 + $0x270] sm:$0xff]  ;;  %v183_v56 = vld [vmem:[#allocation5 + $0x2a8] sm:$0xff]  ;;  %v181_v57 = vld [vmem:[#allocation5 + $0x298] sm:$0xff]  ;;  %v2134_v59 = vpack.c.bf16 %v174_v51, %v170_v50 }
  0x77   :  { %v185_v58 = vld [vmem:[#allocation5 + $0x2b8] sm:$0xff]  ;;  %v2390_v60 = vpack.c.bf16 %v176_v54, %v172_v52  ;;  %v2136_v61 = vpack.c.bf16 %v183_v56, %v179_v55  ;;  %v178_v62 = vld [vmem:[#allocation5 + $0x280] sm:$0xff]  ;;  %v180_v0 = vld [vmem:[#allocation5 + $0x290] sm:$0xff] }
  0x78   :  { %2123 = vmatpush1.bf16.msra.mxu0 %v2122_v23  ;;  %v182_v63 = vld [vmem:[#allocation5 + $0x2a0] sm:$0xff]  ;;  %v2392_v1 = vpack.c.bf16 %v185_v58, %v181_v57  ;;  %v184_v2 = vld [vmem:[#allocation5 + $0x2b0] sm:$0xff]  ;;  %v187_v3 = vld [vmem:[#allocation5 + $0x2c8] sm:$0xff] }
  0x79   :  { %2379 = vmatpush1.bf16.msra.mxu1 %v2378_v24  ;;  %2125 = vmatprep.subr.bf16.mxu0 %v2124_v25  ;;  %v191_v4 = vld [vmem:[#allocation5 + $0x2e8] sm:$0xff]  ;;  %v189_v5 = vld [vmem:[#allocation5 + $0x2d8] sm:$0xff]  ;;  %v2138_v7 = vpack.c.bf16 %v182_v63, %v178_v62  ;;  %v186_v8 = vld [vmem:[#allocation5 + $0x2c0] sm:$0xff]  ;;  %v2394_v9 = vpack.c.bf16 %v184_v2, %v180_v0 }
  0x7a   :  { %2381 = vmatprep.subr.bf16.mxu1 %v2380_v29  ;;  %v193_v6 = vld [vmem:[#allocation5 + $0x2f8] sm:$0xff]  ;;  %v2140_v10 = vpack.c.bf16 %v191_v4, %v187_v3  ;;  %v190_v11 = vld [vmem:[#allocation5 + $0x2e0] sm:$0xff]  ;;  %v188_v12 = vld [vmem:[#allocation5 + $0x2d0] sm:$0xff] }
  0x7b   :  { %v192_v13 = vld [vmem:[#allocation5 + $0x2f0] sm:$0xff]  ;;  %v2396_v14 = vpack.c.bf16 %v193_v6, %v189_v5  ;;  %v195_v15 = vld [vmem:[#allocation5 + $0x308] sm:$0xff]  ;;  %v197_v18 = vld [vmem:[#allocation5 + $0x318] sm:$0xff]  ;;  %v2142_v20 = vpack.c.bf16 %v190_v11, %v186_v8 }
  0x7c   :  { %2127 = vmatpush1.bf16.msra.mxu0 %v2126_v35  ;;  %v199_v16 = vld [vmem:[#allocation5 + $0x328] sm:$0xff]  ;;  %v201_v19 = vld [vmem:[#allocation5 + $0x338] sm:$0xff]  ;;  %v2398_v21 = vpack.c.bf16 %v192_v13, %v188_v12  ;;  %v194_v23 = vld [vmem:[#allocation5 + $0x300] sm:$0xff] }
  0x7d   :  { %2383 = vmatpush1.bf16.msra.mxu1 %v2382_v36  ;;  %2129 = vmatprep.subr.bf16.mxu0 %v2128_v37  ;;  %v91_v17 = vld [vmem:[#allocation3 + $0x8] sm:$0xff]  ;;  %v2144_v22 = vpack.c.bf16 %v199_v16, %v195_v15  ;;  %v198_v24 = vld [vmem:[#allocation5 + $0x320] sm:$0xff]  ;;  %v196_v25 = vld [vmem:[#allocation5 + $0x310] sm:$0xff]  ;;  %v2400_v26 = vpack.c.bf16 %v201_v19, %v197_v18 }
  0x7e   :  { %2385 = vmatprep.subr.bf16.mxu1 %v2384_v41  ;;  %696 = vmatprep.mubr.f32.mxu0 %v91_v17  ;;  %v200_v27 = vld [vmem:[#allocation5 + $0x330] sm:$0xff]  ;;  %v203_v28 = vld [vmem:[#allocation5 + $0x348] sm:$0xff]  ;;  %v205_v30 = vld [vmem:[#allocation5 + $0x358] sm:$0xff]  ;;  %v2146_v32 = vpack.c.bf16 %v198_v24, %v194_v23 }
  0x7f   :  { %980 = vmatprep.mubr.f32.mxu1 %v91_v17  ;;  %v207_v29 = vld [vmem:[#allocation5 + $0x368] sm:$0xff]  ;;  %v209_v31 = vld [vmem:[#allocation5 + $0x378] sm:$0xff]  ;;  %v2402_v33 = vpack.c.bf16 %v200_v27, %v196_v25  ;;  %v202_v35 = vld [vmem:[#allocation5 + $0x340] sm:$0xff] }
  0x80   :  { %2131 = vmatpush1.bf16.msra.mxu0 %v2130_v47  ;;  %v2148_v34 = vpack.c.bf16 %v207_v29, %v203_v28  ;;  %v206_v36 = vld [vmem:[#allocation5 + $0x360] sm:$0xff]  ;;  %v204_v37 = vld [vmem:[#allocation5 + $0x350] sm:$0xff]  ;;  %v2404_v38 = vpack.c.bf16 %v209_v31, %v205_v30  ;;  %v211_v40 = vld [vmem:[#allocation5 + $0x388] sm:$0xff] }
  0x81   :  { %2387 = vmatpush1.bf16.msra.mxu1 %v2386_v48  ;;  %2133 = vmatprep.subr.bf16.mxu0 %v2132_v49  ;;  %v208_v39 = vld [vmem:[#allocation5 + $0x370] sm:$0xff]  ;;  %v215_v41 = vld [vmem:[#allocation5 + $0x3a8] sm:$0xff]  ;;  %v213_v42 = vld [vmem:[#allocation5 + $0x398] sm:$0xff]  ;;  %v2150_v44 = vpack.c.bf16 %v206_v36, %v202_v35 }
  0x82   :  { %2389 = vmatprep.subr.bf16.mxu1 %v2388_v53  ;;  %v217_v43 = vld [vmem:[#allocation5 + $0x3b8] sm:$0xff]  ;;  %v2406_v45 = vpack.c.bf16 %v208_v39, %v204_v37  ;;  %v2152_v46 = vpack.c.bf16 %v215_v41, %v211_v40  ;;  %v210_v47 = vld [vmem:[#allocation5 + $0x380] sm:$0xff]  ;;  %v212_v49 = vld [vmem:[#allocation5 + $0x390] sm:$0xff] }
  0x83   :  { %v214_v48 = vld [vmem:[#allocation5 + $0x3a0] sm:$0xff]  ;;  %v2408_v50 = vpack.c.bf16 %v217_v43, %v213_v42  ;;  %v216_v51 = vld [vmem:[#allocation5 + $0x3b0] sm:$0xff]  ;;  %v219_v52 = vld [vmem:[#allocation5 + $0x3c8] sm:$0xff] }
  0x84   :  { %2135 = vmatpush1.bf16.msra.mxu0 %v2134_v59  ;;  %v223_v53 = vld [vmem:[#allocation5 + $0x3e8] sm:$0xff]  ;;  %v221_v54 = vld [vmem:[#allocation5 + $0x3d8] sm:$0xff]  ;;  %v2154_v56 = vpack.c.bf16 %v214_v48, %v210_v47  ;;  %v2410_v57 = vpack.c.bf16 %v216_v51, %v212_v49  ;;  %v218_v59 = vld [vmem:[#allocation5 + $0x3c0] sm:$0xff] }
  0x85   :  { %2391 = vmatpush1.bf16.msra.mxu1 %v2390_v60  ;;  %2137 = vmatprep.subr.bf16.mxu0 %v2136_v61  ;;  %v225_v55 = vld [vmem:[#allocation5 + $0x3f8] sm:$0xff]  ;;  %v2156_v58 = vpack.c.bf16 %v223_v53, %v219_v52  ;;  %v222_v60 = vld [vmem:[#allocation5 + $0x3e0] sm:$0xff]  ;;  %v220_v61 = vld [vmem:[#allocation5 + $0x3d0] sm:$0xff] }
  0x86   :  { %2393 = vmatprep.subr.bf16.mxu1 %v2392_v1  ;;  %v2412_v62 = vpack.c.bf16 %v225_v55, %v221_v54  ;;  %v224_v63 = vld [vmem:[#allocation5 + $0x3f0] sm:$0xff]  ;;  %v227_v0 = vld [vmem:[#allocation5 + $0x408] sm:$0xff]  ;;  %v229_v2 = vld [vmem:[#allocation5 + $0x418] sm:$0xff]  ;;  %v2158_v4 = vpack.c.bf16 %v222_v60, %v218_v59 }
  0x87   :  { %v231_v1 = vld [vmem:[#allocation5 + $0x428] sm:$0xff]  ;;  %v233_v3 = vld [vmem:[#allocation5 + $0x438] sm:$0xff]  ;;  %v2414_v5 = vpack.c.bf16 %v224_v63, %v220_v61  ;;  %v230_v8 = vld [vmem:[#allocation5 + $0x420] sm:$0xff] }
  0x88   :  { %2139 = vmatpush1.bf16.msra.mxu0 %v2138_v7  ;;  %v2160_v6 = vpack.c.bf16 %v231_v1, %v227_v0  ;;  %v226_v7 = vld [vmem:[#allocation5 + $0x400] sm:$0xff]  ;;  %v232_v11 = vld [vmem:[#allocation5 + $0x430] sm:$0xff]  ;;  %v235_v12 = vld [vmem:[#allocation5 + $0x448] sm:$0xff] }
  0x89   :  { %2395 = vmatpush1.bf16.msra.mxu1 %v2394_v9  ;;  %2141 = vmatprep.subr.bf16.mxu0 %v2140_v10  ;;  %v228_v9 = vld [vmem:[#allocation5 + $0x410] sm:$0xff]  ;;  %v2416_v10 = vpack.c.bf16 %v233_v3, %v229_v2  ;;  %v239_v13 = vld [vmem:[#allocation5 + $0x468] sm:$0xff]  ;;  %v241_v15 = vld [vmem:[#allocation5 + $0x478] sm:$0xff]  ;;  %v2162_v17 = vpack.c.bf16 %v230_v8, %v226_v7 }
  0x8a   :  { %2397 = vmatprep.subr.bf16.mxu1 %v2396_v14  ;;  %v237_v14 = vld [vmem:[#allocation5 + $0x458] sm:$0xff]  ;;  %v90_v16 = vld [vmem:[#allocation3] sm:$0xff]  ;;  %v2418_v18 = vpack.c.bf16 %v232_v11, %v228_v9  ;;  %v2164_v19 = vpack.c.bf16 %v239_v13, %v235_v12  ;;  %v240_v24 = vld [vmem:[#allocation5 + $0x470] sm:$0xff] }
  0x8b   :  { %v2420_v23 = vpack.c.bf16 %v241_v15, %v237_v14  ;;  %v243_v25 = vld [vmem:[#allocation5 + $0x488] sm:$0xff]  ;;  %v245_v27 = vld [vmem:[#allocation5 + $0x498] sm:$0xff]  ;;  %v248_v36 = vld [vmem:[#allocation5 + $0x4b0] sm:$0xff] }
  0x8c   :  { %2143 = vmatpush1.bf16.msra.mxu0 %v2142_v20  ;;  %v234_v20 = vld [vmem:[#allocation5 + $0x440] sm:$0xff]  ;;  %v249_v28 = vld [vmem:[#allocation5 + $0x4b8] sm:$0xff]  ;;  %v251_v37 = vld [vmem:[#allocation5 + $0x4c8] sm:$0xff] }
  0x8d   :  { %2399 = vmatpush1.bf16.msra.mxu1 %v2398_v21  ;;  %2145 = vmatprep.subr.bf16.mxu0 %v2144_v22  ;;  %v238_v21 = vld [vmem:[#allocation5 + $0x460] sm:$0xff]  ;;  %v236_v22 = vld [vmem:[#allocation5 + $0x450] sm:$0xff]  ;;  %v2424_v35 = vpack.c.bf16 %v249_v28, %v245_v27  ;;  %v253_v39 = vld [vmem:[#allocation5 + $0x4d8] sm:$0xff] }
  0x8e   :  { %2401 = vmatprep.subr.bf16.mxu1 %v2400_v26  ;;  %v247_v26 = vld [vmem:[#allocation5 + $0x4a8] sm:$0xff]  ;;  %v2166_v29 = vpack.c.bf16 %v238_v21, %v234_v20  ;;  %v2422_v30 = vpack.c.bf16 %v240_v24, %v236_v22  ;;  %v257_v40 = vld [vmem:[#allocation5 + $0x4f8] sm:$0xff]  ;;  %v256_v48 = vld [vmem:[#allocation5 + $0x4f0] sm:$0xff] }
  0x8f   :  { %v2168_v31 = vpack.c.bf16 %v247_v26, %v243_v25  ;;  %v2428_v47 = vpack.c.bf16 %v257_v40, %v253_v39  ;;  %v259_v49 = vld [vmem:[#allocation5 + $0x508] sm:$0xff]  ;;  %v261_v51 = vld [vmem:[#allocation5 + $0x518] sm:$0xff]  ;;  %v264_v60 = vld [vmem:[#allocation5 + $0x530] sm:$0xff] }
  0x90   :  { %2147 = vmatpush1.bf16.msra.mxu0 %v2146_v32  ;;  %v242_v32 = vld [vmem:[#allocation5 + $0x480] sm:$0xff]  ;;  %v265_v52 = vld [vmem:[#allocation5 + $0x538] sm:$0xff]  ;;  %v267_v61 = vld [vmem:[#allocation5 + $0x548] sm:$0xff] }
  0x91   :  { %2403 = vmatpush1.bf16.msra.mxu1 %v2402_v33  ;;  %2149 = vmatprep.subr.bf16.mxu0 %v2148_v34  ;;  %v246_v33 = vld [vmem:[#allocation5 + $0x4a0] sm:$0xff]  ;;  %v244_v34 = vld [vmem:[#allocation5 + $0x490] sm:$0xff]  ;;  %v2432_v59 = vpack.c.bf16 %v265_v52, %v261_v51  ;;  %v269_v63 = vld [vmem:[#allocation5 + $0x558] sm:$0xff] }
  0x92   :  { %2405 = vmatprep.subr.bf16.mxu1 %v2404_v38  ;;  %v255_v38 = vld [vmem:[#allocation5 + $0x4e8] sm:$0xff]  ;;  %v2170_v41 = vpack.c.bf16 %v246_v33, %v242_v32  ;;  %v2426_v42 = vpack.c.bf16 %v248_v36, %v244_v34  ;;  %v273_v0 = vld [vmem:[#allocation5 + $0x578] sm:$0xff]  ;;  %v272_v8 = vld [vmem:[#allocation5 + $0x570] sm:$0xff] }
  0x93   :  { %v2172_v43 = vpack.c.bf16 %v255_v38, %v251_v37  ;;  %v2436_v7 = vpack.c.bf16 %v273_v0, %v269_v63  ;;  %v275_v9 = vld [vmem:[#allocation5 + $0x588] sm:$0xff]  ;;  %v277_v11 = vld [vmem:[#allocation5 + $0x598] sm:$0xff]  ;;  %v274_v14 = vld [vmem:[#allocation5 + $0x580] sm:$0xff] }
  0x94   :  { %2151 = vmatpush1.bf16.msra.mxu0 %v2150_v44  ;;  %v250_v44 = vld [vmem:[#allocation5 + $0x4c0] sm:$0xff]  ;;  %v281_v12 = vld [vmem:[#allocation5 + $0x5b8] sm:$0xff]  ;;  %v283_v21 = vld [vmem:[#allocation5 + $0x5c8] sm:$0xff] }
  0x95   :  { %2407 = vmatpush1.bf16.msra.mxu1 %v2406_v45  ;;  %2153 = vmatprep.subr.bf16.mxu0 %v2152_v46  ;;  %v254_v45 = vld [vmem:[#allocation5 + $0x4e0] sm:$0xff]  ;;  %v252_v46 = vld [vmem:[#allocation5 + $0x4d0] sm:$0xff]  ;;  %v2440_v20 = vpack.c.bf16 %v281_v12, %v277_v11  ;;  %v287_v22 = vld [vmem:[#allocation5 + $0x5e8] sm:$0xff] }
  0x96   :  { %2409 = vmatprep.subr.bf16.mxu1 %v2408_v50  ;;  %v263_v50 = vld [vmem:[#allocation5 + $0x528] sm:$0xff]  ;;  %v2174_v53 = vpack.c.bf16 %v254_v45, %v250_v44  ;;  %v2430_v54 = vpack.c.bf16 %v256_v48, %v252_v46  ;;  %v285_v24 = vld [vmem:[#allocation5 + $0x5d8] sm:$0xff]  ;;  %v2188_v28 = vpack.c.bf16 %v287_v22, %v283_v21  ;;  %v288_v33 = vld [vmem:[#allocation5 + $0x5f0] sm:$0xff] }
  0x97   :  { %v2176_v55 = vpack.c.bf16 %v263_v50, %v259_v49  ;;  %v289_v25 = vld [vmem:[#allocation5 + $0x5f8] sm:$0xff]  ;;  %v291_v34 = vld [vmem:[#allocation5 + $0x608] sm:$0xff]  ;;  %v296_v45 = vld [vmem:[#allocation5 + $0x630] sm:$0xff] }
  0x98   :  { %2155 = vmatpush1.bf16.msra.mxu0 %v2154_v56  ;;  %v258_v56 = vld [vmem:[#allocation5 + $0x500] sm:$0xff]  ;;  %v2444_v32 = vpack.c.bf16 %v289_v25, %v285_v24  ;;  %v293_v36 = vld [vmem:[#allocation5 + $0x618] sm:$0xff]  ;;  %v299_v46 = vld [vmem:[#allocation5 + $0x648] sm:$0xff] }
  0x99   :  { %2411 = vmatpush1.bf16.msra.mxu1 %v2410_v57  ;;  %2157 = vmatprep.subr.bf16.mxu0 %v2156_v58  ;;  %v262_v57 = vld [vmem:[#allocation5 + $0x520] sm:$0xff]  ;;  %v260_v58 = vld [vmem:[#allocation5 + $0x510] sm:$0xff]  ;;  %v297_v37 = vld [vmem:[#allocation5 + $0x638] sm:$0xff] }
  0x9a   :  { %2413 = vmatprep.subr.bf16.mxu1 %v2412_v62  ;;  %v271_v62 = vld [vmem:[#allocation5 + $0x568] sm:$0xff]  ;;  %v2178_v1 = vpack.c.bf16 %v262_v57, %v258_v56  ;;  %v2434_v2 = vpack.c.bf16 %v264_v60, %v260_v58  ;;  %v2448_v44 = vpack.c.bf16 %v297_v37, %v293_v36  ;;  %v301_v48 = vld [vmem:[#allocation5 + $0x658] sm:$0xff]  ;;  %v304_v57 = vld [vmem:[#allocation5 + $0x670] sm:$0xff] }
  0x9b   :  { %v2180_v3 = vpack.c.bf16 %v271_v62, %v267_v61  ;;  %v305_v49 = vld [vmem:[#allocation5 + $0x678] sm:$0xff]  ;;  %v307_v58 = vld [vmem:[#allocation5 + $0x688] sm:$0xff]  ;;  %v322_v25 = vld [vmem:[#allocation5 + $0x700] sm:$0xff] }
  0x9c   :  { %2159 = vmatpush1.bf16.msra.mxu0 %v2158_v4  ;;  %v266_v4 = vld [vmem:[#allocation5 + $0x540] sm:$0xff]  ;;  %v2452_v56 = vpack.c.bf16 %v305_v49, %v301_v48  ;;  %v309_v60 = vld [vmem:[#allocation5 + $0x698] sm:$0xff] }
  0x9d   :  { %2415 = vmatpush1.bf16.msra.mxu1 %v2414_v5  ;;  %2161 = vmatprep.subr.bf16.mxu0 %v2160_v6  ;;  %v270_v5 = vld [vmem:[#allocation5 + $0x560] sm:$0xff]  ;;  %v268_v6 = vld [vmem:[#allocation5 + $0x550] sm:$0xff]  ;;  %v313_v61 = vld [vmem:[#allocation5 + $0x6b8] sm:$0xff] }
  0x9e   :  { %2417 = vmatprep.subr.bf16.mxu1 %v2416_v10  ;;  %v279_v10 = vld [vmem:[#allocation5 + $0x5a8] sm:$0xff]  ;;  %v2182_v13 = vpack.c.bf16 %v270_v5, %v266_v4  ;;  %v2438_v15 = vpack.c.bf16 %v272_v8, %v268_v6  ;;  %v2456_v4 = vpack.c.bf16 %v313_v61, %v309_v60  ;;  %v312_v5 = vld [vmem:[#allocation5 + $0x6b0] sm:$0xff]  ;;  %v317_v8 = vld [vmem:[#allocation5 + $0x6d8] sm:$0xff] }
  0x9f   :  { %697 = vmatmul.mubr.f32.vlgmr.msra.gmra.mrb[0].mxu0 %v90_v16  ;;  %v315_v6 = vld [vmem:[#allocation5 + $0x6c8] sm:$0xff]  ;;  %v329_v21 = vld [vmem:[#allocation5 + $0x738] sm:$0xff]  ;;  %v330_v37 = vld [vmem:[#allocation5 + $0x740] sm:$0xff] }
  0xa0   :  { %2163 = vmatpush1.bf16.msra.mxu0 %v2162_v17  ;;  %981 = vmatmul.mubr.f32.vlgmr.msra.gmra.mrb[0].mxu1 %v90_v16  ;;  %v2184_v16 = vpack.c.bf16 %v279_v10, %v275_v9  ;;  %v278_v17 = vld [vmem:[#allocation5 + $0x5a0] sm:$0xff]  ;;  %v321_v9 = vld [vmem:[#allocation5 + $0x6f8] sm:$0xff] }
  0xa1   :  { %2419 = vmatpush1.bf16.msra.mxu1 %v2418_v18  ;;  %2165 = vmatprep.subr.bf16.mxu0 %v2164_v19  ;;  %v276_v18 = vld [vmem:[#allocation5 + $0x590] sm:$0xff]  ;;  %v2186_v26 = vpack.c.bf16 %v278_v17, %v274_v14  ;;  %v318_v14 = vld [vmem:[#allocation5 + $0x6e0] sm:$0xff] }
  0xa2   :  { %2421 = vmatprep.subr.bf16.mxu1 %v2420_v23  ;;  %v280_v19 = vld [vmem:[#allocation5 + $0x5b0] sm:$0xff]  ;;  %v93_v23 = vld [vmem:[#allocation3 + $0x18] sm:$0xff]  ;;  %v338_v49 = vld [vmem:[#allocation5 + $0x780] sm:$0xff] }
  0xa3   :  { %767 = vmatprep.mubr.f32.mxu0 %v93_v23  ;;  %1051 = vmatprep.mubr.f32.mxu1 %v93_v23  ;;  %v2442_v27 = vpack.c.bf16 %v280_v19, %v276_v18  ;;  %v320_v17 = vld [vmem:[#allocation5 + $0x6f0] sm:$0xff]  ;;  %v323_v18 = vld [vmem:[#allocation5 + $0x708] sm:$0xff]  ;;  %v346_v61 = vld [vmem:[#allocation5 + $0x7c0] sm:$0xff] }
  0xa4   :  { %2167 = vmatpush1.bf16.msra.mxu0 %v2166_v29  ;;  %v282_v29 = vld [vmem:[#allocation5 + $0x5c0] sm:$0xff]  ;;  %v327_v19 = vld [vmem:[#allocation5 + $0x728] sm:$0xff] }
  0xa5   :  { %2423 = vmatpush1.bf16.msra.mxu1 %v2422_v30  ;;  %2169 = vmatprep.subr.bf16.mxu0 %v2168_v31  ;;  %v286_v30 = vld [vmem:[#allocation5 + $0x5e0] sm:$0xff]  ;;  %v284_v31 = vld [vmem:[#allocation5 + $0x5d0] sm:$0xff]  ;;  %v2208_v24 = vpack.c.bf16 %v327_v19, %v323_v18 }
  0xa6   :  { %2425 = vmatprep.subr.bf16.mxu1 %v2424_v35  ;;  %v295_v35 = vld [vmem:[#allocation5 + $0x628] sm:$0xff]  ;;  %v2190_v38 = vpack.c.bf16 %v286_v30, %v282_v29  ;;  %v2446_v39 = vpack.c.bf16 %v288_v33, %v284_v31  ;;  %v328_v29 = vld [vmem:[#allocation5 + $0x730] sm:$0xff]  ;;  %v337_v33 = vld [vmem:[#allocation5 + $0x778] sm:$0xff] }
  0xa7   :  { %v2192_v40 = vpack.c.bf16 %v295_v35, %v291_v34  ;;  %v331_v30 = vld [vmem:[#allocation5 + $0x748] sm:$0xff]  ;;  %v92_v18 = vld [vmem:[#allocation3 + $0x10] sm:$0xff] }
  0xa8   :  { %2171 = vmatpush1.bf16.msra.mxu0 %v2170_v41  ;;  %v290_v41 = vld [vmem:[#allocation5 + $0x600] sm:$0xff]  ;;  %v335_v31 = vld [vmem:[#allocation5 + $0x768] sm:$0xff] }
  0xa9   :  { %2427 = vmatpush1.bf16.msra.mxu1 %v2426_v42  ;;  %2173 = vmatprep.subr.bf16.mxu0 %v2172_v43  ;;  %v294_v42 = vld [vmem:[#allocation5 + $0x620] sm:$0xff]  ;;  %v292_v43 = vld [vmem:[#allocation5 + $0x610] sm:$0xff]  ;;  %v2212_v36 = vpack.c.bf16 %v335_v31, %v331_v30  ;;  %v377_v30 = vld [vmem:[#allocation5 + $0x8b8] sm:$0xff] }
  0xaa   :  { %2429 = vmatprep.subr.bf16.mxu1 %v2428_v47  ;;  %v303_v47 = vld [vmem:[#allocation5 + $0x668] sm:$0xff]  ;;  %v2194_v50 = vpack.c.bf16 %v294_v42, %v290_v41  ;;  %v2450_v51 = vpack.c.bf16 %v296_v45, %v292_v43  ;;  %v336_v41 = vld [vmem:[#allocation5 + $0x770] sm:$0xff]  ;;  %v345_v45 = vld [vmem:[#allocation5 + $0x7b8] sm:$0xff] }
  0xab   :  { %v2196_v52 = vpack.c.bf16 %v303_v47, %v299_v46  ;;  %v339_v42 = vld [vmem:[#allocation5 + $0x788] sm:$0xff] }
  0xac   :  { %2175 = vmatpush1.bf16.msra.mxu0 %v2174_v53  ;;  %v298_v53 = vld [vmem:[#allocation5 + $0x640] sm:$0xff]  ;;  %v343_v43 = vld [vmem:[#allocation5 + $0x7a8] sm:$0xff] }
  0xad   :  { %2431 = vmatpush1.bf16.msra.mxu1 %v2430_v54  ;;  %2177 = vmatprep.subr.bf16.mxu0 %v2176_v55  ;;  %v302_v54 = vld [vmem:[#allocation5 + $0x660] sm:$0xff]  ;;  %v300_v55 = vld [vmem:[#allocation5 + $0x650] sm:$0xff]  ;;  %v2216_v48 = vpack.c.bf16 %v343_v43, %v339_v42  ;;  %v95_v31 = vld [vmem:[#allocation3 + $0x28] sm:$0xff] }
  0xae   :  { %2433 = vmatprep.subr.bf16.mxu1 %v2432_v59  ;;  %v311_v59 = vld [vmem:[#allocation5 + $0x6a8] sm:$0xff]  ;;  %v2198_v62 = vpack.c.bf16 %v302_v54, %v298_v53  ;;  %v2454_v63 = vpack.c.bf16 %v304_v57, %v300_v55  ;;  %v344_v53 = vld [vmem:[#allocation5 + $0x7b0] sm:$0xff]  ;;  %v353_v57 = vld [vmem:[#allocation5 + $0x7f8] sm:$0xff] }
  0xaf   :  { %v2200_v0 = vpack.c.bf16 %v311_v59, %v307_v58  ;;  %v347_v54 = vld [vmem:[#allocation5 + $0x7c8] sm:$0xff]  ;;  %v381_v42 = vld [vmem:[#allocation5 + $0x8d8] sm:$0xff] }
  0xb0   :  { %2179 = vmatpush1.bf16.msra.mxu0 %v2178_v1  ;;  %v306_v1 = vld [vmem:[#allocation5 + $0x680] sm:$0xff]  ;;  %v351_v55 = vld [vmem:[#allocation5 + $0x7e8] sm:$0xff]  ;;  %v385_v43 = vld [vmem:[#allocation5 + $0x8f8] sm:$0xff] }
  0xb1   :  { %2435 = vmatpush1.bf16.msra.mxu1 %v2434_v2  ;;  %2181 = vmatprep.subr.bf16.mxu0 %v2180_v3  ;;  %v310_v2 = vld [vmem:[#allocation5 + $0x6a0] sm:$0xff]  ;;  %v308_v3 = vld [vmem:[#allocation5 + $0x690] sm:$0xff]  ;;  %v2220_v60 = vpack.c.bf16 %v351_v55, %v347_v54  ;;  %v389_v54 = vld [vmem:[#allocation5 + $0x918] sm:$0xff] }
  0xb2   :  { %2437 = vmatprep.subr.bf16.mxu1 %v2436_v7  ;;  %v319_v7 = vld [vmem:[#allocation5 + $0x6e8] sm:$0xff]  ;;  %v2202_v10 = vpack.c.bf16 %v310_v2, %v306_v1  ;;  %v2458_v11 = vpack.c.bf16 %v312_v5, %v308_v3  ;;  %v352_v1 = vld [vmem:[#allocation5 + $0x7f0] sm:$0xff]  ;;  %v361_v5 = vld [vmem:[#allocation5 + $0x838] sm:$0xff] }
  0xb3   :  { %v2204_v12 = vpack.c.bf16 %v319_v7, %v315_v6  ;;  %v355_v2 = vld [vmem:[#allocation5 + $0x808] sm:$0xff]  ;;  %v393_v55 = vld [vmem:[#allocation5 + $0x938] sm:$0xff] }
  0xb4   :  { %2183 = vmatpush1.bf16.msra.mxu0 %v2182_v13  ;;  %v314_v13 = vld [vmem:[#allocation5 + $0x6c0] sm:$0xff]  ;;  %v359_v3 = vld [vmem:[#allocation5 + $0x828] sm:$0xff] }
  0xb5   :  { %2439 = vmatpush1.bf16.msra.mxu1 %v2438_v15  ;;  %2185 = vmatprep.subr.bf16.mxu0 %v2184_v16  ;;  %v316_v15 = vld [vmem:[#allocation5 + $0x6d0] sm:$0xff]  ;;  %v2460_v16 = vpack.c.bf16 %v321_v9, %v317_v8  ;;  %v2206_v22 = vpack.c.bf16 %v318_v14, %v314_v13  ;;  %v2224_v8 = vpack.c.bf16 %v359_v3, %v355_v2  ;;  %v354_v9 = vld [vmem:[#allocation5 + $0x800] sm:$0xff]  ;;  %v363_v14 = vld [vmem:[#allocation5 + $0x848] sm:$0xff] }
  0xb6   :  { %2441 = vmatprep.subr.bf16.mxu1 %v2440_v20  ;;  %v325_v20 = vld [vmem:[#allocation5 + $0x718] sm:$0xff]  ;;  %v2462_v23 = vpack.c.bf16 %v320_v17, %v316_v15  ;;  %v360_v13 = vld [vmem:[#allocation5 + $0x830] sm:$0xff]  ;;  %v367_v15 = vld [vmem:[#allocation5 + $0x868] sm:$0xff] }
  0xb7   :  { %v369_v17 = vld [vmem:[#allocation5 + $0x878] sm:$0xff] }
  0xb8   :  { %2187 = vmatpush1.bf16.msra.mxu0 %v2186_v26  ;;  %v326_v26 = vld [vmem:[#allocation5 + $0x720] sm:$0xff]  ;;  %v397_v2 = vld [vmem:[#allocation5 + $0x958] sm:$0xff] }
  0xb9   :  { %2443 = vmatpush1.bf16.msra.mxu1 %v2442_v27  ;;  %2189 = vmatprep.subr.bf16.mxu0 %v2188_v28  ;;  %v324_v27 = vld [vmem:[#allocation5 + $0x710] sm:$0xff]  ;;  %v2464_v28 = vpack.c.bf16 %v329_v21, %v325_v20  ;;  %v2210_v34 = vpack.c.bf16 %v326_v26, %v322_v25  ;;  %v2228_v21 = vpack.c.bf16 %v367_v15, %v363_v14  ;;  %v401_v3 = vld [vmem:[#allocation5 + $0x978] sm:$0xff] }
  0xba   :  { %2445 = vmatprep.subr.bf16.mxu1 %v2444_v32  ;;  %v333_v32 = vld [vmem:[#allocation5 + $0x758] sm:$0xff]  ;;  %v2466_v35 = vpack.c.bf16 %v328_v29, %v324_v27  ;;  %v368_v26 = vld [vmem:[#allocation5 + $0x870] sm:$0xff]  ;;  %v371_v27 = vld [vmem:[#allocation5 + $0x888] sm:$0xff] }
  0xbb   :  { %v373_v29 = vld [vmem:[#allocation5 + $0x898] sm:$0xff] }
  0xbc   :  { %2191 = vmatpush1.bf16.msra.mxu0 %v2190_v38  ;;  %v334_v38 = vld [vmem:[#allocation5 + $0x760] sm:$0xff]  ;;  %v405_v14 = vld [vmem:[#allocation5 + $0x998] sm:$0xff] }
  0xbd   :  { %2447 = vmatpush1.bf16.msra.mxu1 %v2446_v39  ;;  %2193 = vmatprep.subr.bf16.mxu0 %v2192_v40  ;;  %v332_v39 = vld [vmem:[#allocation5 + $0x750] sm:$0xff]  ;;  %v2468_v40 = vpack.c.bf16 %v337_v33, %v333_v32  ;;  %v2214_v46 = vpack.c.bf16 %v334_v38, %v330_v37  ;;  %v2488_v38 = vpack.c.bf16 %v377_v30, %v373_v29  ;;  %v409_v15 = vld [vmem:[#allocation5 + $0x9b8] sm:$0xff] }
  0xbe   :  { %2449 = vmatprep.subr.bf16.mxu1 %v2448_v44  ;;  %v341_v44 = vld [vmem:[#allocation5 + $0x798] sm:$0xff]  ;;  %v2470_v47 = vpack.c.bf16 %v336_v41, %v332_v39  ;;  %v372_v37 = vld [vmem:[#allocation5 + $0x890] sm:$0xff]  ;;  %v383_v41 = vld [vmem:[#allocation5 + $0x8e8] sm:$0xff] }
  0xbf   :  { %v376_v39 = vld [vmem:[#allocation5 + $0x8b0] sm:$0xff] }
  0xc0   :  { %2195 = vmatpush1.bf16.msra.mxu0 %v2194_v50  ;;  %v342_v50 = vld [vmem:[#allocation5 + $0x7a0] sm:$0xff] }
  0xc1   :  { %2451 = vmatpush1.bf16.msra.mxu1 %v2450_v51  ;;  %2197 = vmatprep.subr.bf16.mxu0 %v2196_v52  ;;  %v340_v51 = vld [vmem:[#allocation5 + $0x790] sm:$0xff]  ;;  %v2472_v52 = vpack.c.bf16 %v345_v45, %v341_v44  ;;  %v2218_v58 = vpack.c.bf16 %v342_v50, %v338_v49  ;;  %v2490_v45 = vpack.c.bf16 %v376_v39, %v372_v37  ;;  %v423_v37 = vld [vmem:[#allocation5 + $0xa28] sm:$0xff]  ;;  %v425_v39 = vld [vmem:[#allocation5 + $0xa38] sm:$0xff] }
  0xc2   :  { %2453 = vmatprep.subr.bf16.mxu1 %v2452_v56  ;;  %v349_v56 = vld [vmem:[#allocation5 + $0x7d8] sm:$0xff]  ;;  %v2474_v59 = vpack.c.bf16 %v344_v53, %v340_v51  ;;  %v380_v49 = vld [vmem:[#allocation5 + $0x8d0] sm:$0xff]  ;;  %v2492_v50 = vpack.c.bf16 %v385_v43, %v381_v42  ;;  %v391_v53 = vld [vmem:[#allocation5 + $0x928] sm:$0xff] }
  0xc3   :  { %v384_v51 = vld [vmem:[#allocation5 + $0x8f0] sm:$0xff]  ;;  %v418_v43 = vld [vmem:[#allocation5 + $0xa00] sm:$0xff] }
  0xc4   :  { %2199 = vmatpush1.bf16.msra.mxu0 %v2198_v62  ;;  %v350_v62 = vld [vmem:[#allocation5 + $0x7e0] sm:$0xff] }
  0xc5   :  { %2455 = vmatpush1.bf16.msra.mxu1 %v2454_v63  ;;  %2201 = vmatprep.subr.bf16.mxu0 %v2200_v0  ;;  %v348_v63 = vld [vmem:[#allocation5 + $0x7d0] sm:$0xff]  ;;  %v2476_v0 = vpack.c.bf16 %v353_v57, %v349_v56  ;;  %v2222_v6 = vpack.c.bf16 %v350_v62, %v346_v61  ;;  %v2494_v57 = vpack.c.bf16 %v384_v51, %v380_v49  ;;  %v431_v49 = vld [vmem:[#allocation5 + $0xa68] sm:$0xff]  ;;  %v433_v51 = vld [vmem:[#allocation5 + $0xa78] sm:$0xff] }
  0xc6   :  { %2457 = vmatprep.subr.bf16.mxu1 %v2456_v4  ;;  %v357_v4 = vld [vmem:[#allocation5 + $0x818] sm:$0xff]  ;;  %v2478_v7 = vpack.c.bf16 %v352_v1, %v348_v63  ;;  %v388_v61 = vld [vmem:[#allocation5 + $0x910] sm:$0xff]  ;;  %v2496_v62 = vpack.c.bf16 %v393_v55, %v389_v54  ;;  %v399_v1 = vld [vmem:[#allocation5 + $0x968] sm:$0xff] }
  0xc7   :  { %v392_v63 = vld [vmem:[#allocation5 + $0x930] sm:$0xff]  ;;  %v426_v55 = vld [vmem:[#allocation5 + $0xa40] sm:$0xff] }
  0xc8   :  { %2203 = vmatpush1.bf16.msra.mxu0 %v2202_v10  ;;  %v358_v10 = vld [vmem:[#allocation5 + $0x820] sm:$0xff] }
  0xc9   :  { %2459 = vmatpush1.bf16.msra.mxu1 %v2458_v11  ;;  %2205 = vmatprep.subr.bf16.mxu0 %v2204_v12  ;;  %v356_v11 = vld [vmem:[#allocation5 + $0x810] sm:$0xff]  ;;  %v2480_v12 = vpack.c.bf16 %v361_v5, %v357_v4  ;;  %v2226_v19 = vpack.c.bf16 %v358_v10, %v354_v9  ;;  %v2498_v5 = vpack.c.bf16 %v392_v63, %v388_v61  ;;  %v439_v61 = vld [vmem:[#allocation5 + $0xaa8] sm:$0xff]  ;;  %v441_v63 = vld [vmem:[#allocation5 + $0xab8] sm:$0xff] }
  0xca   :  { %2461 = vmatprep.subr.bf16.mxu1 %v2460_v16  ;;  %v365_v16 = vld [vmem:[#allocation5 + $0x858] sm:$0xff]  ;;  %v2482_v20 = vpack.c.bf16 %v360_v13, %v356_v11  ;;  %v396_v9 = vld [vmem:[#allocation5 + $0x950] sm:$0xff]  ;;  %v2500_v10 = vpack.c.bf16 %v401_v3, %v397_v2  ;;  %v407_v13 = vld [vmem:[#allocation5 + $0x9a8] sm:$0xff] }
  0xcb   :  { %v2484_v25 = vpack.c.bf16 %v369_v17, %v365_v16  ;;  %v400_v11 = vld [vmem:[#allocation5 + $0x970] sm:$0xff]  ;;  %v434_v3 = vld [vmem:[#allocation5 + $0xa80] sm:$0xff] }
  0xcc   :  { %2207 = vmatpush1.bf16.msra.mxu0 %v2206_v22  ;;  %v362_v22 = vld [vmem:[#allocation5 + $0x840] sm:$0xff]  ;;  %v2502_v17 = vpack.c.bf16 %v400_v11, %v396_v9  ;;  %v447_v9 = vld [vmem:[#allocation5 + $0xae8] sm:$0xff]  ;;  %v449_v11 = vld [vmem:[#allocation5 + $0xaf8] sm:$0xff] }
  0xcd   :  { %2463 = vmatpush1.bf16.msra.mxu1 %v2462_v23  ;;  %2209 = vmatprep.subr.bf16.mxu0 %v2208_v24  ;;  %v366_v23 = vld [vmem:[#allocation5 + $0x860] sm:$0xff]  ;;  %v364_v24 = vld [vmem:[#allocation5 + $0x850] sm:$0xff] }
  0xce   :  { %2465 = vmatprep.subr.bf16.mxu1 %v2464_v28  ;;  %v375_v28 = vld [vmem:[#allocation5 + $0x8a8] sm:$0xff]  ;;  %v2230_v32 = vpack.c.bf16 %v366_v23, %v362_v22  ;;  %v2486_v33 = vpack.c.bf16 %v368_v26, %v364_v24  ;;  %v2504_v22 = vpack.c.bf16 %v409_v15, %v405_v14  ;;  %v408_v23 = vld [vmem:[#allocation5 + $0x9b0] sm:$0xff]  ;;  %v413_v26 = vld [vmem:[#allocation5 + $0x9d8] sm:$0xff] }
  0xcf   :  { %v411_v24 = vld [vmem:[#allocation5 + $0x9c8] sm:$0xff]  ;;  %v442_v15 = vld [vmem:[#allocation5 + $0xac0] sm:$0xff] }
  0xd0   :  { %2211 = vmatpush1.bf16.msra.mxu0 %v2210_v34  ;;  %v2232_v34 = vpack.c.bf16 %v375_v28, %v371_v27  ;;  %v417_v27 = vld [vmem:[#allocation5 + $0x9f8] sm:$0xff] }
  0xd1   :  { %2467 = vmatpush1.bf16.msra.mxu1 %v2466_v35  ;;  %2213 = vmatprep.subr.bf16.mxu0 %v2212_v36  ;;  %v370_v35 = vld [vmem:[#allocation5 + $0x880] sm:$0xff] }
  0xd2   :  { %2469 = vmatprep.subr.bf16.mxu1 %v2468_v40  ;;  %v374_v36 = vld [vmem:[#allocation5 + $0x8a0] sm:$0xff]  ;;  %v379_v40 = vld [vmem:[#allocation5 + $0x8c8] sm:$0xff] }
  0xd3   :  { %v2234_v44 = vpack.c.bf16 %v374_v36, %v370_v35  ;;  %v416_v35 = vld [vmem:[#allocation5 + $0x9f0] sm:$0xff]  ;;  %v419_v36 = vld [vmem:[#allocation5 + $0xa08] sm:$0xff] }
  0xd4   :  { %2215 = vmatpush1.bf16.msra.mxu0 %v2214_v46  ;;  %v2236_v46 = vpack.c.bf16 %v383_v41, %v379_v40  ;;  %v2256_v42 = vpack.c.bf16 %v423_v37, %v419_v36 }
  0xd5   :  { %2471 = vmatpush1.bf16.msra.mxu1 %v2470_v47  ;;  %2217 = vmatprep.subr.bf16.mxu0 %v2216_v48  ;;  %v378_v47 = vld [vmem:[#allocation5 + $0x8c0] sm:$0xff] }
  0xd6   :  { %2473 = vmatprep.subr.bf16.mxu1 %v2472_v52  ;;  %v382_v48 = vld [vmem:[#allocation5 + $0x8e0] sm:$0xff]  ;;  %v387_v52 = vld [vmem:[#allocation5 + $0x908] sm:$0xff] }
  0xd7   :  { %v2238_v56 = vpack.c.bf16 %v382_v48, %v378_v47  ;;  %v424_v47 = vld [vmem:[#allocation5 + $0xa30] sm:$0xff]  ;;  %v427_v48 = vld [vmem:[#allocation5 + $0xa48] sm:$0xff] }
  0xd8   :  { %2219 = vmatpush1.bf16.msra.mxu0 %v2218_v58  ;;  %v2240_v58 = vpack.c.bf16 %v391_v53, %v387_v52  ;;  %v2260_v54 = vpack.c.bf16 %v431_v49, %v427_v48 }
  0xd9   :  { %2475 = vmatpush1.bf16.msra.mxu1 %v2474_v59  ;;  %2221 = vmatprep.subr.bf16.mxu0 %v2220_v60  ;;  %v386_v59 = vld [vmem:[#allocation5 + $0x900] sm:$0xff] }
  0xda   :  { %2477 = vmatprep.subr.bf16.mxu1 %v2476_v0  ;;  %v390_v60 = vld [vmem:[#allocation5 + $0x920] sm:$0xff]  ;;  %v395_v0 = vld [vmem:[#allocation5 + $0x948] sm:$0xff] }
  0xdb   :  { %v2242_v4 = vpack.c.bf16 %v390_v60, %v386_v59  ;;  %v432_v59 = vld [vmem:[#allocation5 + $0xa70] sm:$0xff]  ;;  %v435_v60 = vld [vmem:[#allocation5 + $0xa88] sm:$0xff] }
  0xdc   :  { %2223 = vmatpush1.bf16.msra.mxu0 %v2222_v6  ;;  %v2244_v6 = vpack.c.bf16 %v399_v1, %v395_v0  ;;  %v2264_v2 = vpack.c.bf16 %v439_v61, %v435_v60 }
  0xdd   :  { %2479 = vmatpush1.bf16.msra.mxu1 %v2478_v7  ;;  %2225 = vmatprep.subr.bf16.mxu0 %v2224_v8  ;;  %v394_v7 = vld [vmem:[#allocation5 + $0x940] sm:$0xff] }
  0xde   :  { %2481 = vmatprep.subr.bf16.mxu1 %v2480_v12  ;;  %v398_v8 = vld [vmem:[#allocation5 + $0x960] sm:$0xff]  ;;  %v403_v12 = vld [vmem:[#allocation5 + $0x988] sm:$0xff] }
  0xdf   :  { %768 = vmatmul.mubr.f32.vlgmr.msra.gmra.mrb[0].mxu0 %v92_v18  ;;  %v2246_v16 = vpack.c.bf16 %v398_v8, %v394_v7  ;;  %v440_v7 = vld [vmem:[#allocation5 + $0xab0] sm:$0xff]  ;;  %v443_v8 = vld [vmem:[#allocation5 + $0xac8] sm:$0xff] }
  0xe0   :  { %2227 = vmatpush1.bf16.msra.mxu0 %v2226_v19  ;;  %1052 = vmatmul.mubr.f32.vlgmr.msra.gmra.mrb[0].mxu1 %v92_v18  ;;  %v2248_v18 = vpack.c.bf16 %v407_v13, %v403_v12  ;;  %v402_v19 = vld [vmem:[#allocation5 + $0x980] sm:$0xff]  ;;  %v2268_v14 = vpack.c.bf16 %v447_v9, %v443_v8 }
  0xe1   :  { %2483 = vmatpush1.bf16.msra.mxu1 %v2482_v20  ;;  %2229 = vmatprep.subr.bf16.mxu0 %v2228_v21  ;;  %v406_v20 = vld [vmem:[#allocation5 + $0x9a0] sm:$0xff]  ;;  %v404_v21 = vld [vmem:[#allocation5 + $0x990] sm:$0xff] }
  0xe2   :  { %2485 = vmatprep.subr.bf16.mxu1 %v2484_v25  ;;  %838 = vmatprep.mubr.f32.mxu0 %v95_v31  ;;  %v415_v25 = vld [vmem:[#allocation5 + $0x9e8] sm:$0xff]  ;;  %v2250_v28 = vpack.c.bf16 %v406_v20, %v402_v19  ;;  %v2506_v29 = vpack.c.bf16 %v408_v23, %v404_v21  ;;  %v448_v19 = vld [vmem:[#allocation5 + $0xaf0] sm:$0xff]  ;;  %v457_v23 = vld [vmem:[#allocation5 + $0xb38] sm:$0xff] }
  0xe3   :  { %1122 = vmatprep.mubr.f32.mxu1 %v95_v31  ;;  %v2252_v30 = vpack.c.bf16 %v415_v25, %v411_v24  ;;  %v410_v31 = vld [vmem:[#allocation5 + $0x9c0] sm:$0xff]  ;;  %v451_v20 = vld [vmem:[#allocation5 + $0xb08] sm:$0xff] }
  0xe4   :  { %2231 = vmatpush1.bf16.msra.mxu0 %v2230_v32  ;;  %v414_v32 = vld [vmem:[#allocation5 + $0x9e0] sm:$0xff]  ;;  %v455_v21 = vld [vmem:[#allocation5 + $0xb28] sm:$0xff] }
  0xe5   :  { %2487 = vmatpush1.bf16.msra.mxu1 %v2486_v33  ;;  %2233 = vmatprep.subr.bf16.mxu0 %v2232_v34  ;;  %v412_v33 = vld [vmem:[#allocation5 + $0x9d0] sm:$0xff]  ;;  %v2508_v34 = vpack.c.bf16 %v417_v27, %v413_v26  ;;  %v2254_v40 = vpack.c.bf16 %v414_v32, %v410_v31  ;;  %v2272_v26 = vpack.c.bf16 %v455_v21, %v451_v20  ;;  %v450_v27 = vld [vmem:[#allocation5 + $0xb00] sm:$0xff]  ;;  %v459_v32 = vld [vmem:[#allocation5 + $0xb48] sm:$0xff] }
  0xe6   :  { %2489 = vmatprep.subr.bf16.mxu1 %v2488_v38  ;;  %v421_v38 = vld [vmem:[#allocation5 + $0xa18] sm:$0xff]  ;;  %v2510_v41 = vpack.c.bf16 %v416_v35, %v412_v33  ;;  %v456_v31 = vld [vmem:[#allocation5 + $0xb30] sm:$0xff]  ;;  %v463_v33 = vld [vmem:[#allocation5 + $0xb68] sm:$0xff] }
  0xe7   :  { %v465_v35 = vld [vmem:[#allocation5 + $0xb78] sm:$0xff]  ;;  %v94_v20 = vld [vmem:[#allocation3 + $0x20] sm:$0xff] }
  0xe8   :  { %2235 = vmatpush1.bf16.msra.mxu0 %v2234_v44  ;;  %v422_v44 = vld [vmem:[#allocation5 + $0xa20] sm:$0xff] }
  0xe9   :  { %2491 = vmatpush1.bf16.msra.mxu1 %v2490_v45  ;;  %2237 = vmatprep.subr.bf16.mxu0 %v2236_v46  ;;  %v420_v45 = vld [vmem:[#allocation5 + $0xa10] sm:$0xff]  ;;  %v2512_v46 = vpack.c.bf16 %v425_v39, %v421_v38  ;;  %v2258_v52 = vpack.c.bf16 %v422_v44, %v418_v43  ;;  %v2276_v38 = vpack.c.bf16 %v463_v33, %v459_v32  ;;  %v458_v39 = vld [vmem:[#allocation5 + $0xb40] sm:$0xff]  ;;  %v467_v44 = vld [vmem:[#allocation5 + $0xb88] sm:$0xff] }
  0xea   :  { %2493 = vmatprep.subr.bf16.mxu1 %v2492_v50  ;;  %v429_v50 = vld [vmem:[#allocation5 + $0xa58] sm:$0xff]  ;;  %v2514_v53 = vpack.c.bf16 %v424_v47, %v420_v45  ;;  %v464_v43 = vld [vmem:[#allocation5 + $0xb70] sm:$0xff]  ;;  %v471_v45 = vld [vmem:[#allocation5 + $0xba8] sm:$0xff] }
  0xeb   :  { %v473_v47 = vld [vmem:[#allocation5 + $0xbb8] sm:$0xff] }
  0xec   :  { %2239 = vmatpush1.bf16.msra.mxu0 %v2238_v56  ;;  %v430_v56 = vld [vmem:[#allocation5 + $0xa60] sm:$0xff]  ;;  %v505_v32 = vld [vmem:[#allocation5 + $0xcb8] sm:$0xff] }
  0xed   :  { %2495 = vmatpush1.bf16.msra.mxu1 %v2494_v57  ;;  %2241 = vmatprep.subr.bf16.mxu0 %v2240_v58  ;;  %v428_v57 = vld [vmem:[#allocation5 + $0xa50] sm:$0xff]  ;;  %v2516_v58 = vpack.c.bf16 %v433_v51, %v429_v50  ;;  %v2262_v0 = vpack.c.bf16 %v430_v56, %v426_v55  ;;  %v2280_v50 = vpack.c.bf16 %v471_v45, %v467_v44  ;;  %v466_v51 = vld [vmem:[#allocation5 + $0xb80] sm:$0xff]  ;;  %v475_v56 = vld [vmem:[#allocation5 + $0xbc8] sm:$0xff] }
  0xee   :  { %2497 = vmatprep.subr.bf16.mxu1 %v2496_v62  ;;  %v437_v62 = vld [vmem:[#allocation5 + $0xa98] sm:$0xff]  ;;  %v2518_v1 = vpack.c.bf16 %v432_v59, %v428_v57  ;;  %v472_v55 = vld [vmem:[#allocation5 + $0xbb0] sm:$0xff]  ;;  %v479_v57 = vld [vmem:[#allocation5 + $0xbe8] sm:$0xff] }
  0xef   :  { %v481_v59 = vld [vmem:[#allocation5 + $0xbf8] sm:$0xff] }
  0xf0   :  { %2243 = vmatpush1.bf16.msra.mxu0 %v2242_v4  ;;  %v438_v4 = vld [vmem:[#allocation5 + $0xaa0] sm:$0xff]  ;;  %v97_v33 = vld [vmem:[#allocation3 + $0x38] sm:$0xff] }
  0xf1   :  { %2499 = vmatpush1.bf16.msra.mxu1 %v2498_v5  ;;  %2245 = vmatprep.subr.bf16.mxu0 %v2244_v6  ;;  %v436_v5 = vld [vmem:[#allocation5 + $0xa90] sm:$0xff]  ;;  %v2520_v6 = vpack.c.bf16 %v441_v63, %v437_v62  ;;  %v2266_v12 = vpack.c.bf16 %v438_v4, %v434_v3  ;;  %v2284_v62 = vpack.c.bf16 %v479_v57, %v475_v56  ;;  %v474_v63 = vld [vmem:[#allocation5 + $0xbc0] sm:$0xff]  ;;  %v483_v4 = vld [vmem:[#allocation5 + $0xc08] sm:$0xff] }
  0xf2   :  { %2501 = vmatprep.subr.bf16.mxu1 %v2500_v10  ;;  %v445_v10 = vld [vmem:[#allocation5 + $0xad8] sm:$0xff]  ;;  %v2522_v13 = vpack.c.bf16 %v440_v7, %v436_v5  ;;  %v480_v3 = vld [vmem:[#allocation5 + $0xbf0] sm:$0xff]  ;;  %v487_v5 = vld [vmem:[#allocation5 + $0xc28] sm:$0xff] }
  0xf3   :  { %v489_v7 = vld [vmem:[#allocation5 + $0xc38] sm:$0xff] }
  0xf4   :  { %2247 = vmatpush1.bf16.msra.mxu0 %v2246_v16  ;;  %v446_v16 = vld [vmem:[#allocation5 + $0xae0] sm:$0xff]  ;;  %v509_v44 = vld [vmem:[#allocation5 + $0xcd8] sm:$0xff] }
  0xf5   :  { %2503 = vmatpush1.bf16.msra.mxu1 %v2502_v17  ;;  %2249 = vmatprep.subr.bf16.mxu0 %v2248_v18  ;;  %v444_v17 = vld [vmem:[#allocation5 + $0xad0] sm:$0xff]  ;;  %v2524_v18 = vpack.c.bf16 %v449_v11, %v445_v10  ;;  %v2270_v24 = vpack.c.bf16 %v446_v16, %v442_v15  ;;  %v2288_v10 = vpack.c.bf16 %v487_v5, %v483_v4  ;;  %v482_v11 = vld [vmem:[#allocation5 + $0xc00] sm:$0xff]  ;;  %v491_v16 = vld [vmem:[#allocation5 + $0xc48] sm:$0xff] }
  0xf6   :  { %2505 = vmatprep.subr.bf16.mxu1 %v2504_v22  ;;  %v453_v22 = vld [vmem:[#allocation5 + $0xb18] sm:$0xff]  ;;  %v2526_v25 = vpack.c.bf16 %v448_v19, %v444_v17  ;;  %v488_v15 = vld [vmem:[#allocation5 + $0xc30] sm:$0xff]  ;;  %v495_v17 = vld [vmem:[#allocation5 + $0xc68] sm:$0xff] }
  0xf7   :  { %v497_v19 = vld [vmem:[#allocation5 + $0xc78] sm:$0xff] }
  0xf8   :  { %2251 = vmatpush1.bf16.msra.mxu0 %v2250_v28  ;;  %v454_v28 = vld [vmem:[#allocation5 + $0xb20] sm:$0xff]  ;;  %v513_v45 = vld [vmem:[#allocation5 + $0xcf8] sm:$0xff] }
  0xf9   :  { %2507 = vmatpush1.bf16.msra.mxu1 %v2506_v29  ;;  %2253 = vmatprep.subr.bf16.mxu0 %v2252_v30  ;;  %v452_v29 = vld [vmem:[#allocation5 + $0xb10] sm:$0xff]  ;;  %v2528_v30 = vpack.c.bf16 %v457_v23, %v453_v22  ;;  %v2274_v36 = vpack.c.bf16 %v454_v28, %v450_v27  ;;  %v2292_v23 = vpack.c.bf16 %v495_v17, %v491_v16  ;;  %v517_v56 = vld [vmem:[#allocation5 + $0xd18] sm:$0xff] }
  0xfa   :  { %2509 = vmatprep.subr.bf16.mxu1 %v2508_v34  ;;  %v461_v34 = vld [vmem:[#allocation5 + $0xb58] sm:$0xff]  ;;  %v2530_v37 = vpack.c.bf16 %v456_v31, %v452_v29  ;;  %v496_v28 = vld [vmem:[#allocation5 + $0xc70] sm:$0xff]  ;;  %v499_v29 = vld [vmem:[#allocation5 + $0xc88] sm:$0xff] }
  0xfb   :  { %v501_v31 = vld [vmem:[#allocation5 + $0xc98] sm:$0xff] }
  0xfc   :  { %2255 = vmatpush1.bf16.msra.mxu0 %v2254_v40  ;;  %v462_v40 = vld [vmem:[#allocation5 + $0xb60] sm:$0xff]  ;;  %v521_v57 = vld [vmem:[#allocation5 + $0xd38] sm:$0xff] }
  0xfd   :  { %2511 = vmatpush1.bf16.msra.mxu1 %v2510_v41  ;;  %2257 = vmatprep.subr.bf16.mxu0 %v2256_v42  ;;  %v460_v41 = vld [vmem:[#allocation5 + $0xb50] sm:$0xff]  ;;  %v2532_v42 = vpack.c.bf16 %v465_v35, %v461_v34  ;;  %v2278_v48 = vpack.c.bf16 %v462_v40, %v458_v39  ;;  %v2552_v40 = vpack.c.bf16 %v505_v32, %v501_v31  ;;  %v525_v4 = vld [vmem:[#allocation5 + $0xd58] sm:$0xff] }
  0xfe   :  { %2513 = vmatprep.subr.bf16.mxu1 %v2512_v46  ;;  %v469_v46 = vld [vmem:[#allocation5 + $0xb98] sm:$0xff]  ;;  %v2534_v49 = vpack.c.bf16 %v464_v43, %v460_v41  ;;  %v500_v39 = vld [vmem:[#allocation5 + $0xc90] sm:$0xff]  ;;  %v511_v43 = vld [vmem:[#allocation5 + $0xce8] sm:$0xff] }
  0xff   :  { %v504_v41 = vld [vmem:[#allocation5 + $0xcb0] sm:$0xff]  ;;  %v529_v5 = vld [vmem:[#allocation5 + $0xd78] sm:$0xff] }
 0x100   :  { %2259 = vmatpush1.bf16.msra.mxu0 %v2258_v52  ;;  %v470_v52 = vld [vmem:[#allocation5 + $0xba0] sm:$0xff]  ;;  %v533_v16 = vld [vmem:[#allocation5 + $0xd98] sm:$0xff] }
 0x101   :  { %2515 = vmatpush1.bf16.msra.mxu1 %v2514_v53  ;;  %2261 = vmatprep.subr.bf16.mxu0 %v2260_v54  ;;  %v468_v53 = vld [vmem:[#allocation5 + $0xb90] sm:$0xff]  ;;  %v2536_v54 = vpack.c.bf16 %v473_v47, %v469_v46  ;;  %v2282_v60 = vpack.c.bf16 %v470_v52, %v466_v51  ;;  %v2554_v47 = vpack.c.bf16 %v504_v41, %v500_v39  ;;  %v537_v17 = vld [vmem:[#allocation5 + $0xdb8] sm:$0xff]  ;;  %v551_v39 = vld [vmem:[#allocation5 + $0xe28] sm:$0xff] }
 0x102   :  { %2517 = vmatprep.subr.bf16.mxu1 %v2516_v58  ;;  %v477_v58 = vld [vmem:[#allocation5 + $0xbd8] sm:$0xff]  ;;  %v2538_v61 = vpack.c.bf16 %v472_v55, %v468_v53  ;;  %v508_v51 = vld [vmem:[#allocation5 + $0xcd0] sm:$0xff]  ;;  %v2556_v52 = vpack.c.bf16 %v513_v45, %v509_v44  ;;  %v519_v55 = vld [vmem:[#allocation5 + $0xd28] sm:$0xff] }
 0x103   :  { %v512_v53 = vld [vmem:[#allocation5 + $0xcf0] sm:$0xff]  ;;  %v553_v41 = vld [vmem:[#allocation5 + $0xe38] sm:$0xff]  ;;  %v546_v45 = vld [vmem:[#allocation5 + $0xe00] sm:$0xff] }
 0x104   :  { %2263 = vmatpush1.bf16.msra.mxu0 %v2262_v0  ;;  %v478_v0 = vld [vmem:[#allocation5 + $0xbe0] sm:$0xff] }
 0x105   :  { %2519 = vmatpush1.bf16.msra.mxu1 %v2518_v1  ;;  %2265 = vmatprep.subr.bf16.mxu0 %v2264_v2  ;;  %v476_v1 = vld [vmem:[#allocation5 + $0xbd0] sm:$0xff]  ;;  %v2540_v2 = vpack.c.bf16 %v481_v59, %v477_v58  ;;  %v2286_v8 = vpack.c.bf16 %v478_v0, %v474_v63  ;;  %v2558_v59 = vpack.c.bf16 %v512_v53, %v508_v51  ;;  %v559_v51 = vld [vmem:[#allocation5 + $0xe68] sm:$0xff]  ;;  %v561_v53 = vld [vmem:[#allocation5 + $0xe78] sm:$0xff] }
 0x106   :  { %2521 = vmatprep.subr.bf16.mxu1 %v2520_v6  ;;  %v485_v6 = vld [vmem:[#allocation5 + $0xc18] sm:$0xff]  ;;  %v2542_v9 = vpack.c.bf16 %v480_v3, %v476_v1  ;;  %v516_v63 = vld [vmem:[#allocation5 + $0xd10] sm:$0xff]  ;;  %v2560_v0 = vpack.c.bf16 %v521_v57, %v517_v56  ;;  %v527_v3 = vld [vmem:[#allocation5 + $0xd68] sm:$0xff] }
 0x107   :  { %v520_v1 = vld [vmem:[#allocation5 + $0xd30] sm:$0xff]  ;;  %v554_v57 = vld [vmem:[#allocation5 + $0xe40] sm:$0xff] }
 0x108   :  { %2267 = vmatpush1.bf16.msra.mxu0 %v2266_v12  ;;  %v486_v12 = vld [vmem:[#allocation5 + $0xc20] sm:$0xff] }
 0x109   :  { %2523 = vmatpush1.bf16.msra.mxu1 %v2522_v13  ;;  %2269 = vmatprep.subr.bf16.mxu0 %v2268_v14  ;;  %v484_v13 = vld [vmem:[#allocation5 + $0xc10] sm:$0xff]  ;;  %v2544_v14 = vpack.c.bf16 %v489_v7, %v485_v6  ;;  %v2290_v21 = vpack.c.bf16 %v486_v12, %v482_v11  ;;  %v2562_v7 = vpack.c.bf16 %v520_v1, %v516_v63  ;;  %v567_v63 = vld [vmem:[#allocation5 + $0xea8] sm:$0xff]  ;;  %v569_v1 = vld [vmem:[#allocation5 + $0xeb8] sm:$0xff] }
 0x10a   :  { %2525 = vmatprep.subr.bf16.mxu1 %v2524_v18  ;;  %v493_v18 = vld [vmem:[#allocation5 + $0xc58] sm:$0xff]  ;;  %v2546_v22 = vpack.c.bf16 %v488_v15, %v484_v13  ;;  %v524_v11 = vld [vmem:[#allocation5 + $0xd50] sm:$0xff]  ;;  %v2564_v12 = vpack.c.bf16 %v529_v5, %v525_v4  ;;  %v535_v15 = vld [vmem:[#allocation5 + $0xda8] sm:$0xff] }
 0x10b   :  { %v2548_v27 = vpack.c.bf16 %v497_v19, %v493_v18  ;;  %v528_v13 = vld [vmem:[#allocation5 + $0xd70] sm:$0xff]  ;;  %v562_v5 = vld [vmem:[#allocation5 + $0xe80] sm:$0xff] }
 0x10c   :  { %2271 = vmatpush1.bf16.msra.mxu0 %v2270_v24  ;;  %v490_v24 = vld [vmem:[#allocation5 + $0xc40] sm:$0xff]  ;;  %v2566_v19 = vpack.c.bf16 %v528_v13, %v524_v11  ;;  %v575_v11 = vld [vmem:[#allocation5 + $0xee8] sm:$0xff]  ;;  %v577_v13 = vld [vmem:[#allocation5 + $0xef8] sm:$0xff] }
 0x10d   :  { %2527 = vmatpush1.bf16.msra.mxu1 %v2526_v25  ;;  %2273 = vmatprep.subr.bf16.mxu0 %v2272_v26  ;;  %v494_v25 = vld [vmem:[#allocation5 + $0xc60] sm:$0xff]  ;;  %v492_v26 = vld [vmem:[#allocation5 + $0xc50] sm:$0xff] }
 0x10e   :  { %2529 = vmatprep.subr.bf16.mxu1 %v2528_v30  ;;  %v503_v30 = vld [vmem:[#allocation5 + $0xca8] sm:$0xff]  ;;  %v2294_v34 = vpack.c.bf16 %v494_v25, %v490_v24  ;;  %v2550_v35 = vpack.c.bf16 %v496_v28, %v492_v26  ;;  %v2568_v24 = vpack.c.bf16 %v537_v17, %v533_v16  ;;  %v536_v25 = vld [vmem:[#allocation5 + $0xdb0] sm:$0xff]  ;;  %v541_v28 = vld [vmem:[#allocation5 + $0xdd8] sm:$0xff] }
 0x10f   :  { %v539_v26 = vld [vmem:[#allocation5 + $0xdc8] sm:$0xff]  ;;  %v570_v17 = vld [vmem:[#allocation5 + $0xec0] sm:$0xff] }
 0x110   :  { %2275 = vmatpush1.bf16.msra.mxu0 %v2274_v36  ;;  %v2296_v36 = vpack.c.bf16 %v503_v30, %v499_v29  ;;  %v545_v29 = vld [vmem:[#allocation5 + $0xdf8] sm:$0xff] }
 0x111   :  { %2531 = vmatpush1.bf16.msra.mxu1 %v2530_v37  ;;  %2277 = vmatprep.subr.bf16.mxu0 %v2276_v38  ;;  %v498_v37 = vld [vmem:[#allocation5 + $0xc80] sm:$0xff] }
 0x112   :  { %2533 = vmatprep.subr.bf16.mxu1 %v2532_v42  ;;  %v502_v38 = vld [vmem:[#allocation5 + $0xca0] sm:$0xff]  ;;  %v507_v42 = vld [vmem:[#allocation5 + $0xcc8] sm:$0xff] }
 0x113   :  { %v2298_v46 = vpack.c.bf16 %v502_v38, %v498_v37  ;;  %v544_v37 = vld [vmem:[#allocation5 + $0xdf0] sm:$0xff]  ;;  %v547_v38 = vld [vmem:[#allocation5 + $0xe08] sm:$0xff] }
 0x114   :  { %2279 = vmatpush1.bf16.msra.mxu0 %v2278_v48  ;;  %v2300_v48 = vpack.c.bf16 %v511_v43, %v507_v42  ;;  %v2320_v44 = vpack.c.bf16 %v551_v39, %v547_v38 }
 0x115   :  { %2535 = vmatpush1.bf16.msra.mxu1 %v2534_v49  ;;  %2281 = vmatprep.subr.bf16.mxu0 %v2280_v50  ;;  %v506_v49 = vld [vmem:[#allocation5 + $0xcc0] sm:$0xff] }
 0x116   :  { %2537 = vmatprep.subr.bf16.mxu1 %v2536_v54  ;;  %v510_v50 = vld [vmem:[#allocation5 + $0xce0] sm:$0xff]  ;;  %v515_v54 = vld [vmem:[#allocation5 + $0xd08] sm:$0xff] }
 0x117   :  { %v2302_v58 = vpack.c.bf16 %v510_v50, %v506_v49  ;;  %v552_v49 = vld [vmem:[#allocation5 + $0xe30] sm:$0xff]  ;;  %v555_v50 = vld [vmem:[#allocation5 + $0xe48] sm:$0xff] }
 0x118   :  { %2283 = vmatpush1.bf16.msra.mxu0 %v2282_v60  ;;  %v2304_v60 = vpack.c.bf16 %v519_v55, %v515_v54  ;;  %v2324_v56 = vpack.c.bf16 %v559_v51, %v555_v50 }
 0x119   :  { %2539 = vmatpush1.bf16.msra.mxu1 %v2538_v61  ;;  %2285 = vmatprep.subr.bf16.mxu0 %v2284_v62  ;;  %v514_v61 = vld [vmem:[#allocation5 + $0xd00] sm:$0xff] }
 0x11a   :  { %2541 = vmatprep.subr.bf16.mxu1 %v2540_v2  ;;  %v518_v62 = vld [vmem:[#allocation5 + $0xd20] sm:$0xff]  ;;  %v523_v2 = vld [vmem:[#allocation5 + $0xd48] sm:$0xff] }
 0x11b   :  { %v2306_v6 = vpack.c.bf16 %v518_v62, %v514_v61  ;;  %v560_v61 = vld [vmem:[#allocation5 + $0xe70] sm:$0xff]  ;;  %v563_v62 = vld [vmem:[#allocation5 + $0xe88] sm:$0xff] }
 0x11c   :  { %2287 = vmatpush1.bf16.msra.mxu0 %v2286_v8  ;;  %v2308_v8 = vpack.c.bf16 %v527_v3, %v523_v2  ;;  %v2328_v4 = vpack.c.bf16 %v567_v63, %v563_v62 }
 0x11d   :  { %2543 = vmatpush1.bf16.msra.mxu1 %v2542_v9  ;;  %2289 = vmatprep.subr.bf16.mxu0 %v2288_v10  ;;  %v522_v9 = vld [vmem:[#allocation5 + $0xd40] sm:$0xff] }
 0x11e   :  { %2545 = vmatprep.subr.bf16.mxu1 %v2544_v14  ;;  %v526_v10 = vld [vmem:[#allocation5 + $0xd60] sm:$0xff]  ;;  %v531_v14 = vld [vmem:[#allocation5 + $0xd88] sm:$0xff] }
 0x11f   :  { %839 = vmatmul.mubr.f32.vlgmr.msra.gmra.mrb[0].mxu0 %v94_v20  ;;  %v2310_v18 = vpack.c.bf16 %v526_v10, %v522_v9  ;;  %v568_v9 = vld [vmem:[#allocation5 + $0xeb0] sm:$0xff]  ;;  %v571_v10 = vld [vmem:[#allocation5 + $0xec8] sm:$0xff] }
 0x120   :  { %2291 = vmatpush1.bf16.msra.mxu0 %v2290_v21  ;;  %1123 = vmatmul.mubr.f32.vlgmr.msra.gmra.mrb[0].mxu1 %v94_v20  ;;  %v2312_v20 = vpack.c.bf16 %v535_v15, %v531_v14  ;;  %v530_v21 = vld [vmem:[#allocation5 + $0xd80] sm:$0xff]  ;;  %v2332_v16 = vpack.c.bf16 %v575_v11, %v571_v10 }
 0x121   :  { %2547 = vmatpush1.bf16.msra.mxu1 %v2546_v22  ;;  %2293 = vmatprep.subr.bf16.mxu0 %v2292_v23  ;;  %v534_v22 = vld [vmem:[#allocation5 + $0xda0] sm:$0xff]  ;;  %v532_v23 = vld [vmem:[#allocation5 + $0xd90] sm:$0xff] }
 0x122   :  { %2549 = vmatprep.subr.bf16.mxu1 %v2548_v27  ;;  %909 = vmatprep.mubr.f32.mxu0 %v97_v33  ;;  %v543_v27 = vld [vmem:[#allocation5 + $0xde8] sm:$0xff]  ;;  %v2314_v30 = vpack.c.bf16 %v534_v22, %v530_v21  ;;  %v2570_v31 = vpack.c.bf16 %v536_v25, %v532_v23  ;;  %v576_v21 = vld [vmem:[#allocation5 + $0xef0] sm:$0xff]  ;;  %v585_v25 = vld [vmem:[#allocation5 + $0xf38] sm:$0xff] }
 0x123   :  { %1193 = vmatprep.mubr.f32.mxu1 %v97_v33  ;;  %v2316_v32 = vpack.c.bf16 %v543_v27, %v539_v26  ;;  %v538_v33 = vld [vmem:[#allocation5 + $0xdc0] sm:$0xff]  ;;  %v579_v22 = vld [vmem:[#allocation5 + $0xf08] sm:$0xff] }
 0x124   :  { %2295 = vmatpush1.bf16.msra.mxu0 %v2294_v34  ;;  %v542_v34 = vld [vmem:[#allocation5 + $0xde0] sm:$0xff]  ;;  %v583_v23 = vld [vmem:[#allocation5 + $0xf28] sm:$0xff] }
 0x125   :  { %2551 = vmatpush1.bf16.msra.mxu1 %v2550_v35  ;;  %2297 = vmatprep.subr.bf16.mxu0 %v2296_v36  ;;  %v540_v35 = vld [vmem:[#allocation5 + $0xdd0] sm:$0xff]  ;;  %v2572_v36 = vpack.c.bf16 %v545_v29, %v541_v28  ;;  %v2318_v42 = vpack.c.bf16 %v542_v34, %v538_v33  ;;  %v2336_v28 = vpack.c.bf16 %v583_v23, %v579_v22  ;;  %v578_v29 = vld [vmem:[#allocation5 + $0xf00] sm:$0xff]  ;;  %v587_v34 = vld [vmem:[#allocation5 + $0xf48] sm:$0xff] }
 0x126   :  { %2553 = vmatprep.subr.bf16.mxu1 %v2552_v40  ;;  %v549_v40 = vld [vmem:[#allocation5 + $0xe18] sm:$0xff]  ;;  %v2574_v43 = vpack.c.bf16 %v544_v37, %v540_v35  ;;  %v584_v33 = vld [vmem:[#allocation5 + $0xf30] sm:$0xff]  ;;  %v591_v35 = vld [vmem:[#allocation5 + $0xf68] sm:$0xff] }
 0x127   :  { %v593_v37 = vld [vmem:[#allocation5 + $0xf78] sm:$0xff]  ;;  %v96_v22 = vld [vmem:[#allocation3 + $0x30] sm:$0xff] }
 0x128   :  { %2299 = vmatpush1.bf16.msra.mxu0 %v2298_v46  ;;  %v550_v46 = vld [vmem:[#allocation5 + $0xe20] sm:$0xff] }
 0x129   :  { %2555 = vmatpush1.bf16.msra.mxu1 %v2554_v47  ;;  %2301 = vmatprep.subr.bf16.mxu0 %v2300_v48  ;;  %v548_v47 = vld [vmem:[#allocation5 + $0xe10] sm:$0xff]  ;;  %v2576_v48 = vpack.c.bf16 %v553_v41, %v549_v40  ;;  %v2322_v54 = vpack.c.bf16 %v550_v46, %v546_v45  ;;  %v2340_v40 = vpack.c.bf16 %v591_v35, %v587_v34  ;;  %v586_v41 = vld [vmem:[#allocation5 + $0xf40] sm:$0xff]  ;;  %v595_v46 = vld [vmem:[#allocation5 + $0xf88] sm:$0xff] }
 0x12a   :  { %2557 = vmatprep.subr.bf16.mxu1 %v2556_v52  ;;  %v557_v52 = vld [vmem:[#allocation5 + $0xe58] sm:$0xff]  ;;  %v2578_v55 = vpack.c.bf16 %v552_v49, %v548_v47  ;;  %v592_v45 = vld [vmem:[#allocation5 + $0xf70] sm:$0xff]  ;;  %v599_v47 = vld [vmem:[#allocation5 + $0xfa8] sm:$0xff] }
 0x12b   :  { %v601_v49 = vld [vmem:[#allocation5 + $0xfb8] sm:$0xff] }
 0x12c   :  { %2303 = vmatpush1.bf16.msra.mxu0 %v2302_v58  ;;  %v558_v58 = vld [vmem:[#allocation5 + $0xe60] sm:$0xff] }
 0x12d   :  { %2559 = vmatpush1.bf16.msra.mxu1 %v2558_v59  ;;  %2305 = vmatprep.subr.bf16.mxu0 %v2304_v60  ;;  %v556_v59 = vld [vmem:[#allocation5 + $0xe50] sm:$0xff]  ;;  %v2580_v60 = vpack.c.bf16 %v561_v53, %v557_v52  ;;  %v2326_v2 = vpack.c.bf16 %v558_v58, %v554_v57  ;;  %v2344_v52 = vpack.c.bf16 %v599_v47, %v595_v46  ;;  %v594_v53 = vld [vmem:[#allocation5 + $0xf80] sm:$0xff]  ;;  %v603_v58 = vld [vmem:[#allocation5 + $0xfc8] sm:$0xff] }
 0x12e   :  { %2561 = vmatprep.subr.bf16.mxu1 %v2560_v0  ;;  %v565_v0 = vld [vmem:[#allocation5 + $0xe98] sm:$0xff]  ;;  %v2582_v3 = vpack.c.bf16 %v560_v61, %v556_v59  ;;  %v600_v57 = vld [vmem:[#allocation5 + $0xfb0] sm:$0xff]  ;;  %v607_v59 = vld [vmem:[#allocation5 + $0xfe8] sm:$0xff] }
 0x12f   :  { %v609_v61 = vld [vmem:[#allocation5 + $0xff8] sm:$0xff] }
 0x130   :  { %2307 = vmatpush1.bf16.msra.mxu0 %v2306_v6  ;;  %v566_v6 = vld [vmem:[#allocation5 + $0xea0] sm:$0xff] }
 0x131   :  { %2563 = vmatpush1.bf16.msra.mxu1 %v2562_v7  ;;  %2309 = vmatprep.subr.bf16.mxu0 %v2308_v8  ;;  %v564_v7 = vld [vmem:[#allocation5 + $0xe90] sm:$0xff]  ;;  %v2584_v8 = vpack.c.bf16 %v569_v1, %v565_v0  ;;  %v2330_v14 = vpack.c.bf16 %v566_v6, %v562_v5  ;;  %v2348_v0 = vpack.c.bf16 %v607_v59, %v603_v58  ;;  %v602_v1 = vld [vmem:[#allocation5 + $0xfc0] sm:$0xff] }
 0x132   :  { %2565 = vmatprep.subr.bf16.mxu1 %v2564_v12  ;;  %v573_v12 = vld [vmem:[#allocation5 + $0xed8] sm:$0xff]  ;;  %v2586_v15 = vpack.c.bf16 %v568_v9, %v564_v7  ;;  %v608_v5 = vld [vmem:[#allocation5 + $0xff0] sm:$0xff] }
 0x133   :  { %v1225_v6 = vld [vmem:[#allocation8 + $0x8] sm:$0xff]  ;;  %v1231_v9 = vld [vmem:[#allocation8 + $0x38] sm:$0xff] }
 0x134   :  { %2311 = vmatpush1.bf16.msra.mxu0 %v2310_v18  ;;  %v574_v18 = vld [vmem:[#allocation5 + $0xee0] sm:$0xff]  ;;  %v1229_v7 = vld [vmem:[#allocation8 + $0x28] sm:$0xff] }
 0x135   :  { %2567 = vmatpush1.bf16.msra.mxu1 %v2566_v19  ;;  %2313 = vmatprep.subr.bf16.mxu0 %v2312_v20  ;;  %v572_v19 = vld [vmem:[#allocation5 + $0xed0] sm:$0xff]  ;;  %v2588_v20 = vpack.c.bf16 %v577_v13, %v573_v12  ;;  %v2334_v26 = vpack.c.bf16 %v574_v18, %v570_v17  ;;  %v2608_v12 = vpack.c.bf16 %v1229_v7, %v1225_v6  ;;  %v1224_v13 = vld [vmem:[#allocation8] sm:$0xff]  ;;  %v1247_v34 = vld [vmem:[#allocation8 + $0xb8] sm:$0xff] }
 0x136   :  { %2569 = vmatprep.subr.bf16.mxu1 %v2568_v24  ;;  %v581_v24 = vld [vmem:[#allocation5 + $0xf18] sm:$0xff]  ;;  %v2590_v27 = vpack.c.bf16 %v576_v21, %v572_v19  ;;  %v1233_v18 = vld [vmem:[#allocation8 + $0x48] sm:$0xff] }
 0x137   :  { %v1230_v17 = vld [vmem:[#allocation8 + $0x30] sm:$0xff]  ;;  %v1237_v19 = vld [vmem:[#allocation8 + $0x68] sm:$0xff]  ;;  %v1239_v21 = vld [vmem:[#allocation8 + $0x78] sm:$0xff] }
 0x138   :  { %2315 = vmatpush1.bf16.msra.mxu0 %v2314_v30  ;;  %v582_v30 = vld [vmem:[#allocation5 + $0xf20] sm:$0xff] }
 0x139   :  { %2571 = vmatpush1.bf16.msra.mxu1 %v2570_v31  ;;  %2317 = vmatprep.subr.bf16.mxu0 %v2316_v32  ;;  %v580_v31 = vld [vmem:[#allocation5 + $0xf10] sm:$0xff]  ;;  %v2592_v32 = vpack.c.bf16 %v585_v25, %v581_v24  ;;  %v2338_v38 = vpack.c.bf16 %v582_v30, %v578_v29  ;;  %v2612_v25 = vpack.c.bf16 %v1237_v19, %v1233_v18  ;;  %v1255_v46 = vld [vmem:[#allocation8 + $0xf8] sm:$0xff] }
 0x13a   :  { %2573 = vmatprep.subr.bf16.mxu1 %v2572_v36  ;;  %v589_v36 = vld [vmem:[#allocation5 + $0xf58] sm:$0xff]  ;;  %v2594_v39 = vpack.c.bf16 %v584_v33, %v580_v31  ;;  %v1241_v31 = vld [vmem:[#allocation8 + $0x88] sm:$0xff] }
 0x13b   :  { %v1238_v30 = vld [vmem:[#allocation8 + $0x70] sm:$0xff]  ;;  %v1243_v33 = vld [vmem:[#allocation8 + $0x98] sm:$0xff] }
 0x13c   :  { %2319 = vmatpush1.bf16.msra.mxu0 %v2318_v42  ;;  %v590_v42 = vld [vmem:[#allocation5 + $0xf60] sm:$0xff] }
 0x13d   :  { %2575 = vmatpush1.bf16.msra.mxu1 %v2574_v43  ;;  %2321 = vmatprep.subr.bf16.mxu0 %v2320_v44  ;;  %v588_v43 = vld [vmem:[#allocation5 + $0xf50] sm:$0xff]  ;;  %v2596_v44 = vpack.c.bf16 %v593_v37, %v589_v36  ;;  %v2342_v50 = vpack.c.bf16 %v590_v42, %v586_v41  ;;  %v2744_v41 = vpack.c.bf16 %v1247_v34, %v1243_v33  ;;  %v1263_v58 = vld [vmem:[#allocation8 + $0x138] sm:$0xff]  ;;  %v1280_v34 = vld [vmem:[#allocation8 + $0x1c0] sm:$0xff] }
 0x13e   :  { %2577 = vmatprep.subr.bf16.mxu1 %v2576_v48  ;;  %v597_v48 = vld [vmem:[#allocation5 + $0xf98] sm:$0xff]  ;;  %v2598_v51 = vpack.c.bf16 %v592_v45, %v588_v43  ;;  %v1249_v43 = vld [vmem:[#allocation8 + $0xc8] sm:$0xff] }
 0x13f   :  { %v1246_v42 = vld [vmem:[#allocation8 + $0xb0] sm:$0xff]  ;;  %v1251_v45 = vld [vmem:[#allocation8 + $0xd8] sm:$0xff] }
 0x140   :  { %2323 = vmatpush1.bf16.msra.mxu0 %v2322_v54  ;;  %v598_v54 = vld [vmem:[#allocation5 + $0xfa0] sm:$0xff] }
 0x141   :  { %2579 = vmatpush1.bf16.msra.mxu1 %v2578_v55  ;;  %2325 = vmatprep.subr.bf16.mxu0 %v2324_v56  ;;  %v596_v55 = vld [vmem:[#allocation5 + $0xf90] sm:$0xff]  ;;  %v2600_v56 = vpack.c.bf16 %v601_v49, %v597_v48  ;;  %v2346_v62 = vpack.c.bf16 %v598_v54, %v594_v53  ;;  %v2748_v53 = vpack.c.bf16 %v1255_v46, %v1251_v45  ;;  %v1271_v6 = vld [vmem:[#allocation8 + $0x178] sm:$0xff] }
 0x142   :  { %2581 = vmatprep.subr.bf16.mxu1 %v2580_v60  ;;  %v605_v60 = vld [vmem:[#allocation5 + $0xfd8] sm:$0xff]  ;;  %v2602_v63 = vpack.c.bf16 %v600_v57, %v596_v55  ;;  %v1257_v55 = vld [vmem:[#allocation8 + $0x108] sm:$0xff] }
 0x143   :  { %v1254_v54 = vld [vmem:[#allocation8 + $0xf0] sm:$0xff]  ;;  %v1259_v57 = vld [vmem:[#allocation8 + $0x118] sm:$0xff] }
 0x144   :  { %2327 = vmatpush1.bf16.msra.mxu0 %v2326_v2  ;;  %v606_v2 = vld [vmem:[#allocation5 + $0xfe0] sm:$0xff] }
 0x145   :  { %2583 = vmatpush1.bf16.msra.mxu1 %v2582_v3  ;;  %2329 = vmatprep.subr.bf16.mxu0 %v2328_v4  ;;  %v604_v3 = vld [vmem:[#allocation5 + $0xfd0] sm:$0xff]  ;;  %v2604_v4 = vpack.c.bf16 %v609_v61, %v605_v60  ;;  %v2350_v10 = vpack.c.bf16 %v606_v2, %v602_v1  ;;  %v2752_v1 = vpack.c.bf16 %v1263_v58, %v1259_v57  ;;  %v1279_v18 = vld [vmem:[#allocation8 + $0x1b8] sm:$0xff]  ;;  %v1296_v58 = vld [vmem:[#allocation8 + $0x240] sm:$0xff] }
 0x146   :  { %2585 = vmatprep.subr.bf16.mxu1 %v2584_v8  ;;  %v1227_v8 = vld [vmem:[#allocation8 + $0x18] sm:$0xff]  ;;  %v2606_v11 = vpack.c.bf16 %v608_v5, %v604_v3  ;;  %v1262_v2 = vld [vmem:[#allocation8 + $0x130] sm:$0xff]  ;;  %v1265_v3 = vld [vmem:[#allocation8 + $0x148] sm:$0xff] }
 0x147   :  { %v1267_v5 = vld [vmem:[#allocation8 + $0x158] sm:$0xff] }
 0x148   :  { %2331 = vmatpush1.bf16.msra.mxu0 %v2330_v14  ;;  %v1228_v14 = vld [vmem:[#allocation8 + $0x20] sm:$0xff]  ;;  %v1295_v45 = vld [vmem:[#allocation8 + $0x238] sm:$0xff] }
 0x149   :  { %2587 = vmatpush1.bf16.msra.mxu1 %v2586_v15  ;;  %2333 = vmatprep.subr.bf16.mxu0 %v2332_v16  ;;  %v1226_v15 = vld [vmem:[#allocation8 + $0x10] sm:$0xff]  ;;  %v2736_v16 = vpack.c.bf16 %v1231_v9, %v1227_v8  ;;  %v2610_v23 = vpack.c.bf16 %v1228_v14, %v1224_v13  ;;  %v2756_v13 = vpack.c.bf16 %v1271_v6, %v1267_v5  ;;  %v1303_v57 = vld [vmem:[#allocation8 + $0x278] sm:$0xff]  ;;  %v1304_v6 = vld [vmem:[#allocation8 + $0x280] sm:$0xff] }
 0x14a   :  { %2589 = vmatprep.subr.bf16.mxu1 %v2588_v20  ;;  %v1235_v20 = vld [vmem:[#allocation8 + $0x58] sm:$0xff]  ;;  %v2738_v24 = vpack.c.bf16 %v1230_v17, %v1226_v15  ;;  %v1270_v14 = vld [vmem:[#allocation8 + $0x170] sm:$0xff]  ;;  %v1273_v15 = vld [vmem:[#allocation8 + $0x188] sm:$0xff] }
 0x14b   :  { %v2740_v29 = vpack.c.bf16 %v1239_v21, %v1235_v20  ;;  %v1275_v17 = vld [vmem:[#allocation8 + $0x198] sm:$0xff] }
 0x14c   :  { %2335 = vmatpush1.bf16.msra.mxu0 %v2334_v26  ;;  %v1232_v26 = vld [vmem:[#allocation8 + $0x40] sm:$0xff]  ;;  %v1311_v5 = vld [vmem:[#allocation8 + $0x2b8] sm:$0xff] }
 0x14d   :  { %2591 = vmatpush1.bf16.msra.mxu1 %v2590_v27  ;;  %2337 = vmatprep.subr.bf16.mxu0 %v2336_v28  ;;  %v1236_v27 = vld [vmem:[#allocation8 + $0x60] sm:$0xff]  ;;  %v1234_v28 = vld [vmem:[#allocation8 + $0x50] sm:$0xff] }
 0x14e   :  { %2593 = vmatprep.subr.bf16.mxu1 %v2592_v32  ;;  %v1245_v32 = vld [vmem:[#allocation8 + $0xa8] sm:$0xff]  ;;  %v2614_v35 = vpack.c.bf16 %v1236_v27, %v1232_v26  ;;  %v2742_v36 = vpack.c.bf16 %v1238_v30, %v1234_v28  ;;  %v1278_v26 = vld [vmem:[#allocation8 + $0x1b0] sm:$0xff]  ;;  %v1287_v30 = vld [vmem:[#allocation8 + $0x1f8] sm:$0xff] }
 0x14f   :  { %v2616_v37 = vpack.c.bf16 %v1245_v32, %v1241_v31  ;;  %v1281_v27 = vld [vmem:[#allocation8 + $0x1c8] sm:$0xff] }
 0x150   :  { %2339 = vmatpush1.bf16.msra.mxu0 %v2338_v38  ;;  %v1240_v38 = vld [vmem:[#allocation8 + $0x80] sm:$0xff]  ;;  %v1285_v28 = vld [vmem:[#allocation8 + $0x1e8] sm:$0xff] }
 0x151   :  { %2595 = vmatpush1.bf16.msra.mxu1 %v2594_v39  ;;  %2341 = vmatprep.subr.bf16.mxu0 %v2340_v40  ;;  %v1244_v39 = vld [vmem:[#allocation8 + $0xa0] sm:$0xff]  ;;  %v1242_v40 = vld [vmem:[#allocation8 + $0x90] sm:$0xff]  ;;  %v2636_v33 = vpack.c.bf16 %v1285_v28, %v1281_v27  ;;  %v1323_v27 = vld [vmem:[#allocation8 + $0x318] sm:$0xff] }
 0x152   :  { %2597 = vmatprep.subr.bf16.mxu1 %v2596_v44  ;;  %v1253_v44 = vld [vmem:[#allocation8 + $0xe8] sm:$0xff]  ;;  %v2618_v47 = vpack.c.bf16 %v1244_v39, %v1240_v38  ;;  %v2746_v48 = vpack.c.bf16 %v1246_v42, %v1242_v40  ;;  %v1286_v38 = vld [vmem:[#allocation8 + $0x1f0] sm:$0xff] }
 0x153   :  { %v2620_v49 = vpack.c.bf16 %v1253_v44, %v1249_v43  ;;  %v1293_v42 = vld [vmem:[#allocation8 + $0x228] sm:$0xff]  ;;  %v1291_v43 = vld [vmem:[#allocation8 + $0x218] sm:$0xff] }
 0x154   :  { %2343 = vmatpush1.bf16.msra.mxu0 %v2342_v50  ;;  %v1248_v50 = vld [vmem:[#allocation8 + $0xc0] sm:$0xff]  ;;  %v2768_v46 = vpack.c.bf16 %v1295_v45, %v1291_v43 }
 0x155   :  { %2599 = vmatpush1.bf16.msra.mxu1 %v2598_v51  ;;  %2345 = vmatprep.subr.bf16.mxu0 %v2344_v52  ;;  %v1252_v51 = vld [vmem:[#allocation8 + $0xe0] sm:$0xff]  ;;  %v1250_v52 = vld [vmem:[#allocation8 + $0xd0] sm:$0xff] }
 0x156   :  { %2601 = vmatprep.subr.bf16.mxu1 %v2600_v56  ;;  %v1261_v56 = vld [vmem:[#allocation8 + $0x128] sm:$0xff]  ;;  %v2622_v59 = vpack.c.bf16 %v1252_v51, %v1248_v50  ;;  %v2750_v60 = vpack.c.bf16 %v1254_v54, %v1250_v52  ;;  %v1294_v51 = vld [vmem:[#allocation8 + $0x230] sm:$0xff]  ;;  %v1332_v43 = vld [vmem:[#allocation8 + $0x360] sm:$0xff] }
 0x157   :  { %v2624_v61 = vpack.c.bf16 %v1261_v56, %v1257_v55  ;;  %v1301_v54 = vld [vmem:[#allocation8 + $0x268] sm:$0xff]  ;;  %v1299_v55 = vld [vmem:[#allocation8 + $0x258] sm:$0xff] }
 0x158   :  { %2347 = vmatpush1.bf16.msra.mxu0 %v2346_v62  ;;  %v1256_v62 = vld [vmem:[#allocation8 + $0x100] sm:$0xff] }
 0x159   :  { %2603 = vmatpush1.bf16.msra.mxu1 %v2602_v63  ;;  %2349 = vmatprep.subr.bf16.mxu0 %v2348_v0  ;;  %v1260_v63 = vld [vmem:[#allocation8 + $0x120] sm:$0xff]  ;;  %v1258_v0 = vld [vmem:[#allocation8 + $0x110] sm:$0xff] }
 0x15a   :  { %2605 = vmatprep.subr.bf16.mxu1 %v2604_v4  ;;  %v1269_v4 = vld [vmem:[#allocation8 + $0x168] sm:$0xff]  ;;  %v2626_v7 = vpack.c.bf16 %v1260_v63, %v1256_v62  ;;  %v2754_v8 = vpack.c.bf16 %v1262_v2, %v1258_v0  ;;  %v1298_v62 = vld [vmem:[#allocation8 + $0x250] sm:$0xff] }
 0x15b   :  { %v2628_v9 = vpack.c.bf16 %v1269_v4, %v1265_v3  ;;  %v1302_v63 = vld [vmem:[#allocation8 + $0x270] sm:$0xff]  ;;  %v1309_v2 = vld [vmem:[#allocation8 + $0x2a8] sm:$0xff]  ;;  %v1307_v3 = vld [vmem:[#allocation8 + $0x298] sm:$0xff] }
 0x15c   :  { %2351 = vmatpush1.bf16.msra.mxu0 %v2350_v10  ;;  %v1264_v10 = vld [vmem:[#allocation8 + $0x140] sm:$0xff]  ;;  %v2774_v0 = vpack.c.bf16 %v1302_v63, %v1298_v62  ;;  %v1349_v62 = vld [vmem:[#allocation8 + $0x3e8] sm:$0xff]  ;;  %v1347_v63 = vld [vmem:[#allocation8 + $0x3d8] sm:$0xff] }
 0x15d   :  { %2607 = vmatpush1.bf16.msra.mxu1 %v2606_v11  ;;  %2609 = vmatprep.subr.bf16.mxu0 %v2608_v12  ;;  %v1268_v11 = vld [vmem:[#allocation8 + $0x160] sm:$0xff]  ;;  %v1266_v12 = vld [vmem:[#allocation8 + $0x150] sm:$0xff] }
 0x15e   :  { %2737 = vmatprep.subr.bf16.mxu1 %v2736_v16  ;;  %v1277_v16 = vld [vmem:[#allocation8 + $0x1a8] sm:$0xff]  ;;  %v2630_v19 = vpack.c.bf16 %v1268_v11, %v1264_v10  ;;  %v2758_v20 = vpack.c.bf16 %v1270_v14, %v1266_v12  ;;  %v1306_v10 = vld [vmem:[#allocation8 + $0x290] sm:$0xff] }
 0x15f   :  { %910 = vmatmul.mubr.f32.vlgmr.msra.gmra.mrb[0].mxu0 %v96_v22  ;;  %v2632_v21 = vpack.c.bf16 %v1277_v16, %v1273_v15  ;;  %v1310_v11 = vld [vmem:[#allocation8 + $0x2b0] sm:$0xff]  ;;  %v1317_v14 = vld [vmem:[#allocation8 + $0x2e8] sm:$0xff]  ;;  %v1315_v15 = vld [vmem:[#allocation8 + $0x2d8] sm:$0xff] }
 0x160   :  { %1194 = vmatmul.mubr.f32.vlgmr.msra.gmra.mrb[0].mxu1 %v96_v22  ;;  %2611 = vmatpush1.bf16.msra.mxu0 %v2610_v23  ;;  %v1272_v22 = vld [vmem:[#allocation8 + $0x180] sm:$0xff]  ;;  %v2778_v12 = vpack.c.bf16 %v1310_v11, %v1306_v10  ;;  %v1357_v10 = vld [vmem:[#allocation8 + $0x428] sm:$0xff]  ;;  %v1355_v11 = vld [vmem:[#allocation8 + $0x418] sm:$0xff] }
 0x161   :  { %2739 = vmatpush1.bf16.msra.mxu1 %v2738_v24  ;;  %2613 = vmatprep.subr.bf16.mxu0 %v2612_v25  ;;  %v1276_v23 = vld [vmem:[#allocation8 + $0x1a0] sm:$0xff]  ;;  %v1274_v24 = vld [vmem:[#allocation8 + $0x190] sm:$0xff]  ;;  %v2760_v25 = vpack.c.bf16 %v1279_v18, %v1275_v17  ;;  %v1319_v17 = vld [vmem:[#allocation8 + $0x2f8] sm:$0xff] }
 0x162   :  { %2741 = vmatprep.subr.bf16.mxu1 %v2740_v29  ;;  %v1283_v29 = vld [vmem:[#allocation8 + $0x1d8] sm:$0xff]  ;;  %v2634_v31 = vpack.c.bf16 %v1276_v23, %v1272_v22  ;;  %v2762_v32 = vpack.c.bf16 %v1278_v26, %v1274_v24  ;;  %v1312_v18 = vld [vmem:[#allocation8 + $0x2c0] sm:$0xff]  ;;  %v1314_v22 = vld [vmem:[#allocation8 + $0x2d0] sm:$0xff] }
 0x163   :  { %v1318_v23 = vld [vmem:[#allocation8 + $0x2f0] sm:$0xff]  ;;  %v1325_v26 = vld [vmem:[#allocation8 + $0x328] sm:$0xff] }
 0x164   :  { %2615 = vmatpush1.bf16.msra.mxu0 %v2614_v35  ;;  %v1284_v35 = vld [vmem:[#allocation8 + $0x1e0] sm:$0xff]  ;;  %v2782_v24 = vpack.c.bf16 %v1318_v23, %v1314_v22 }
 0x165   :  { %2743 = vmatpush1.bf16.msra.mxu1 %v2742_v36  ;;  %2617 = vmatprep.subr.bf16.mxu0 %v2616_v37  ;;  %v2764_v36 = vpack.c.bf16 %v1287_v30, %v1283_v29  ;;  %v1282_v37 = vld [vmem:[#allocation8 + $0x1d0] sm:$0xff]  ;;  %v2638_v39 = vpack.c.bf16 %v1284_v35, %v1280_v34  ;;  %v1327_v29 = vld [vmem:[#allocation8 + $0x338] sm:$0xff]  ;;  %v1320_v30 = vld [vmem:[#allocation8 + $0x300] sm:$0xff] }
 0x166   :  { %2745 = vmatprep.subr.bf16.mxu1 %v2744_v41  ;;  %v2766_v40 = vpack.c.bf16 %v1286_v38, %v1282_v37  ;;  %v1289_v41 = vld [vmem:[#allocation8 + $0x208] sm:$0xff]  ;;  %v1322_v34 = vld [vmem:[#allocation8 + $0x310] sm:$0xff] }
 0x167   :  { %v2640_v44 = vpack.c.bf16 %v1293_v42, %v1289_v41  ;;  %v1326_v35 = vld [vmem:[#allocation8 + $0x330] sm:$0xff]  ;;  %v1329_v37 = vld [vmem:[#allocation8 + $0x348] sm:$0xff]  ;;  %v1335_v41 = vld [vmem:[#allocation8 + $0x378] sm:$0xff] }
 0x168   :  { %2619 = vmatpush1.bf16.msra.mxu0 %v2618_v47  ;;  %v1288_v47 = vld [vmem:[#allocation8 + $0x200] sm:$0xff]  ;;  %v1333_v38 = vld [vmem:[#allocation8 + $0x368] sm:$0xff] }
 0x169   :  { %2747 = vmatpush1.bf16.msra.mxu1 %v2746_v48  ;;  %2621 = vmatprep.subr.bf16.mxu0 %v2620_v49  ;;  %v1292_v48 = vld [vmem:[#allocation8 + $0x220] sm:$0xff]  ;;  %v1290_v49 = vld [vmem:[#allocation8 + $0x210] sm:$0xff] }
 0x16a   :  { %2749 = vmatprep.subr.bf16.mxu1 %v2748_v53  ;;  %v2642_v50 = vpack.c.bf16 %v1292_v48, %v1288_v47  ;;  %v2770_v52 = vpack.c.bf16 %v1294_v51, %v1290_v49  ;;  %v1297_v53 = vld [vmem:[#allocation8 + $0x248] sm:$0xff]  ;;  %v1328_v42 = vld [vmem:[#allocation8 + $0x340] sm:$0xff]  ;;  %v1334_v47 = vld [vmem:[#allocation8 + $0x370] sm:$0xff] }
 0x16b   :  { %v2644_v56 = vpack.c.bf16 %v1301_v54, %v1297_v53  ;;  %v2662_v45 = vpack.c.bf16 %v1332_v43, %v1328_v42  ;;  %v1337_v49 = vld [vmem:[#allocation8 + $0x388] sm:$0xff]  ;;  %v1339_v51 = vld [vmem:[#allocation8 + $0x398] sm:$0xff]  ;;  %v1336_v54 = vld [vmem:[#allocation8 + $0x380] sm:$0xff] }
 0x16c   :  { %2623 = vmatpush1.bf16.msra.mxu0 %v2622_v59  ;;  %v1300_v59 = vld [vmem:[#allocation8 + $0x260] sm:$0xff]  ;;  %v1343_v53 = vld [vmem:[#allocation8 + $0x3b8] sm:$0xff] }
 0x16d   :  { %2751 = vmatpush1.bf16.msra.mxu1 %v2750_v60  ;;  %2625 = vmatprep.subr.bf16.mxu0 %v2624_v61  ;;  %v2772_v60 = vpack.c.bf16 %v1303_v57, %v1299_v55  ;;  %v2646_v61 = vpack.c.bf16 %v1300_v59, %v1296_v58  ;;  %v1340_v55 = vld [vmem:[#allocation8 + $0x3a0] sm:$0xff]  ;;  %v1338_v58 = vld [vmem:[#allocation8 + $0x390] sm:$0xff] }
 0x16e   :  { %2753 = vmatprep.subr.bf16.mxu1 %v2752_v1  ;;  %v1305_v1 = vld [vmem:[#allocation8 + $0x288] sm:$0xff]  ;;  %v2666_v57 = vpack.c.bf16 %v1340_v55, %v1336_v54  ;;  %v1342_v59 = vld [vmem:[#allocation8 + $0x3b0] sm:$0xff]  ;;  %v1352_v43 = vld [vmem:[#allocation8 + $0x400] sm:$0xff] }
 0x16f   :  { %v2648_v4 = vpack.c.bf16 %v1309_v2, %v1305_v1  ;;  %v1364_v54 = vld [vmem:[#allocation8 + $0x460] sm:$0xff] }
 0x170   :  { %2627 = vmatpush1.bf16.msra.mxu0 %v2626_v7  ;;  %v1308_v7 = vld [vmem:[#allocation8 + $0x2a0] sm:$0xff] }
 0x171   :  { %2755 = vmatpush1.bf16.msra.mxu1 %v2754_v8  ;;  %2629 = vmatprep.subr.bf16.mxu0 %v2628_v9  ;;  %v2776_v8 = vpack.c.bf16 %v1311_v5, %v1307_v3  ;;  %v2650_v9 = vpack.c.bf16 %v1308_v7, %v1304_v6  ;;  %v1344_v3 = vld [vmem:[#allocation8 + $0x3c0] sm:$0xff]  ;;  %v1346_v5 = vld [vmem:[#allocation8 + $0x3d0] sm:$0xff] }
 0x172   :  { %2757 = vmatprep.subr.bf16.mxu1 %v2756_v13  ;;  %v1313_v13 = vld [vmem:[#allocation8 + $0x2c8] sm:$0xff]  ;;  %v1350_v7 = vld [vmem:[#allocation8 + $0x3f0] sm:$0xff] }
 0x173   :  { %v2652_v16 = vpack.c.bf16 %v1317_v14, %v1313_v13  ;;  %v1359_v13 = vld [vmem:[#allocation8 + $0x438] sm:$0xff] }
 0x174   :  { %2631 = vmatpush1.bf16.msra.mxu0 %v2630_v19  ;;  %v1316_v19 = vld [vmem:[#allocation8 + $0x2e0] sm:$0xff]  ;;  %v2800_v14 = vpack.c.bf16 %v1359_v13, %v1355_v11  ;;  %v1381_v11 = vld [vmem:[#allocation8 + $0x4e8] sm:$0xff]  ;;  %v1383_v13 = vld [vmem:[#allocation8 + $0x4f8] sm:$0xff] }
 0x175   :  { %2759 = vmatpush1.bf16.msra.mxu1 %v2758_v20  ;;  %2633 = vmatprep.subr.bf16.mxu0 %v2632_v21  ;;  %v2780_v20 = vpack.c.bf16 %v1319_v17, %v1315_v15  ;;  %v2654_v21 = vpack.c.bf16 %v1316_v19, %v1312_v18  ;;  %v612_v15 = vlaneseq  ;;  %v3222_v18 = vld [vmem:[#allocation7] sm:$0xf] }
 0x176   :  { %2761 = vmatprep.subr.bf16.mxu1 %v2760_v25  ;;  %v1321_v25 = vld [vmem:[#allocation8 + $0x308] sm:$0xff] }
 0x177   :  { %v2656_v28 = vpack.c.bf16 %v1325_v26, %v1321_v25 }
 0x178   :  { %2635 = vmatpush1.bf16.msra.mxu0 %v2634_v31  ;;  %v1324_v31 = vld [vmem:[#allocation8 + $0x320] sm:$0xff] }
 0x179   :  { %2763 = vmatpush1.bf16.msra.mxu1 %v2762_v32  ;;  %2637 = vmatprep.subr.bf16.mxu0 %v2636_v33  ;;  %v2784_v32 = vpack.c.bf16 %v1327_v29, %v1323_v27  ;;  %v2658_v33 = vpack.c.bf16 %v1324_v31, %v1320_v30 }
 0x17a   :  { %2765 = vmatprep.subr.bf16.mxu1 %v2764_v36  ;;  %v2786_v36 = vpack.c.bf16 %v1326_v35, %v1322_v34 }
 0x17c   :  { %2639 = vmatpush1.bf16.msra.mxu0 %v2638_v39  ;;  %v1331_v39 = vld [vmem:[#allocation8 + $0x358] sm:$0xff] }
 0x17d   :  { %2767 = vmatpush1.bf16.msra.mxu1 %v2766_v40  ;;  %2641 = vmatprep.subr.bf16.mxu0 %v2640_v44  ;;  %v2660_v40 = vpack.c.bf16 %v1333_v38, %v1329_v37  ;;  %v2788_v44 = vpack.c.bf16 %v1335_v41, %v1331_v39 }
 0x17e   :  { %2769 = vmatprep.subr.bf16.mxu1 %v2768_v46  ;;  %v1330_v46 = vld [vmem:[#allocation8 + $0x350] sm:$0xff] }
 0x17f   :  { %v2790_v48 = vpack.c.bf16 %v1334_v47, %v1330_v46  ;;  %v1358_v46 = vld [vmem:[#allocation8 + $0x430] sm:$0xff]  ;;  %v1361_v47 = vld [vmem:[#allocation8 + $0x448] sm:$0xff] }
 0x180   :  { %2643 = vmatpush1.bf16.msra.mxu0 %v2642_v50  ;;  %v1341_v50 = vld [vmem:[#allocation8 + $0x3a8] sm:$0xff] }
 0x181   :  { %2771 = vmatpush1.bf16.msra.mxu1 %v2770_v52  ;;  %2645 = vmatprep.subr.bf16.mxu0 %v2644_v56  ;;  %v2664_v52 = vpack.c.bf16 %v1341_v50, %v1337_v49  ;;  %v2792_v56 = vpack.c.bf16 %v1343_v53, %v1339_v51  ;;  %v1363_v49 = vld [vmem:[#allocation8 + $0x458] sm:$0xff]  ;;  %v1360_v53 = vld [vmem:[#allocation8 + $0x440] sm:$0xff] }
 0x182   :  { %2773 = vmatprep.subr.bf16.mxu1 %v2772_v60  ;;  %v1345_v60 = vld [vmem:[#allocation8 + $0x3c8] sm:$0xff]  ;;  %v1367_v50 = vld [vmem:[#allocation8 + $0x478] sm:$0xff] }
 0x183   :  { %v2668_v1 = vpack.c.bf16 %v1349_v62, %v1345_v60  ;;  %v1373_v62 = vld [vmem:[#allocation8 + $0x4a8] sm:$0xff] }
 0x184   :  { %2647 = vmatpush1.bf16.msra.mxu0 %v2646_v61  ;;  %v2794_v61 = vpack.c.bf16 %v1342_v59, %v1338_v58  ;;  %v1369_v58 = vld [vmem:[#allocation8 + $0x488] sm:$0xff] }
 0x185   :  { %2775 = vmatpush1.bf16.msra.mxu1 %v2774_v0  ;;  %2649 = vmatprep.subr.bf16.mxu0 %v2648_v4  ;;  %v1351_v0 = vld [vmem:[#allocation8 + $0x3f8] sm:$0xff]  ;;  %v1348_v4 = vld [vmem:[#allocation8 + $0x3e0] sm:$0xff] }
 0x186   :  { %2777 = vmatprep.subr.bf16.mxu1 %v2776_v8  ;;  %v2796_v2 = vpack.c.bf16 %v1351_v0, %v1347_v63  ;;  %v2670_v6 = vpack.c.bf16 %v1348_v4, %v1344_v3  ;;  %v2798_v8 = vpack.c.bf16 %v1350_v7, %v1346_v5  ;;  %v1371_v63 = vld [vmem:[#allocation8 + $0x498] sm:$0xff]  ;;  %v1368_v4 = vld [vmem:[#allocation8 + $0x480] sm:$0xff] }
 0x187   :  { %v1375_v0 = vld [vmem:[#allocation8 + $0x4b8] sm:$0xff]  ;;  %v1372_v5 = vld [vmem:[#allocation8 + $0x4a0] sm:$0xff] }
 0x188   :  { %2651 = vmatpush1.bf16.msra.mxu0 %v2650_v9  ;;  %v1353_v9 = vld [vmem:[#allocation8 + $0x408] sm:$0xff]  ;;  %v2808_v7 = vpack.c.bf16 %v1375_v0, %v1371_v63  ;;  %v1402_v63 = vld [vmem:[#allocation8 + $0x590] sm:$0xff] }
 0x189   :  { %2779 = vmatpush1.bf16.msra.mxu1 %v2778_v12  ;;  %2653 = vmatprep.subr.bf16.mxu0 %v2652_v16  ;;  %v2672_v12 = vpack.c.bf16 %v1357_v10, %v1353_v9  ;;  %v3219_v16 = vshrl.u32 %v612_v15, 7  ;;  %v1374_v9 = vld [vmem:[#allocation8 + $0x4b0] sm:$0xff]  ;;  %v1377_v10 = vld [vmem:[#allocation8 + $0x4c8] sm:$0xff] }
 0x18a   :  { %2781 = vmatprep.subr.bf16.mxu1 %v2780_v20  ;;  %v1406_v0 = vld [vmem:[#allocation8 + $0x5b0] sm:$0xff] }
 0x18b   :  { %v614_v17 = vsub.s32 0, %v3219_v16  ;;  %v618_v19 = vsub.s32 1, %v3219_v16  ;;  %v626_v20 = vsub.s32 3, %v3219_v16 }
 0x18c   :  { %2655 = vmatpush1.bf16.msra.mxu0 %v2654_v21 }
 0x18d   :  { %2783 = vmatpush1.bf16.msra.mxu1 %v2782_v24  ;;  %2657 = vmatprep.subr.bf16.mxu0 %v2656_v28  ;;  %v615_v21 = vrot.slane %v3222_v18, %v614_v17  ;;  %v619_v22 = vrot.slane %v3222_v18, %v618_v19  ;;  %v627_v23 = vrot.slane %v3222_v18, %v626_v20 }
 0x18e   :  { %2785 = vmatprep.subr.bf16.mxu1 %v2784_v32 }
 0x190   :  { %2659 = vmatpush1.bf16.msra.mxu0 %v2658_v33 }
 0x191   :  { %2787 = vmatpush1.bf16.msra.mxu1 %v2786_v36  ;;  %2661 = vmatprep.subr.bf16.mxu0 %v2660_v40 }
 0x192   :  { %2789 = vmatprep.subr.bf16.mxu1 %v2788_v44  ;;  %v1356_v44 = vld [vmem:[#allocation8 + $0x420] sm:$0xff] }
 0x193   :  { %v2674_v51 = vpack.c.bf16 %v1356_v44, %v1352_v43  ;;  %v1399_v43 = vld [vmem:[#allocation8 + $0x578] sm:$0xff] }
 0x194   :  { %2663 = vmatpush1.bf16.msra.mxu0 %v2662_v45  ;;  %v1354_v45 = vld [vmem:[#allocation8 + $0x410] sm:$0xff] }
 0x195   :  { %2791 = vmatpush1.bf16.msra.mxu1 %v2790_v48  ;;  %2665 = vmatprep.subr.bf16.mxu0 %v2664_v52  ;;  %v1365_v48 = vld [vmem:[#allocation8 + $0x468] sm:$0xff]  ;;  %v2802_v52 = vpack.c.bf16 %v1358_v46, %v1354_v45  ;;  %v1392_v46 = vld [vmem:[#allocation8 + $0x540] sm:$0xff] }
 0x196   :  { %2793 = vmatprep.subr.bf16.mxu1 %v2792_v56  ;;  %v1362_v56 = vld [vmem:[#allocation8 + $0x450] sm:$0xff]  ;;  %v2676_v60 = vpack.c.bf16 %v1365_v48, %v1361_v47  ;;  %v1396_v47 = vld [vmem:[#allocation8 + $0x560] sm:$0xff] }
 0x198   :  { %2667 = vmatpush1.bf16.msra.mxu0 %v2666_v57  ;;  %v1366_v57 = vld [vmem:[#allocation8 + $0x470] sm:$0xff] }
 0x199   :  { %2795 = vmatpush1.bf16.msra.mxu1 %v2794_v61  ;;  %2669 = vmatprep.subr.bf16.mxu0 %v2668_v1  ;;  %v2804_v61 = vpack.c.bf16 %v1367_v50, %v1363_v49  ;;  %v2806_v3 = vpack.c.bf16 %v1366_v57, %v1362_v56  ;;  %v1394_v50 = vld [vmem:[#allocation8 + $0x550] sm:$0xff]  ;;  %v622_v56 = vsub.s32 2, %v3219_v16  ;;  %v2694_v57 = vpack.c.bf16 %v1396_v47, %v1392_v46  ;;  %v1435_v46 = vld [vmem:[#allocation8 + $0x698] sm:$0xff] }
 0x19a   :  { %2797 = vmatprep.subr.bf16.mxu1 %v2796_v2  ;;  %v2678_v2 = vpack.c.bf16 %v1364_v54, %v1360_v53  ;;  %v1405_v53 = vld [vmem:[#allocation8 + $0x5a8] sm:$0xff]  ;;  %v1403_v54 = vld [vmem:[#allocation8 + $0x598] sm:$0xff] }
 0x19b   :  { %v1439_v47 = vld [vmem:[#allocation8 + $0x6b8] sm:$0xff] }
 0x19c   :  { %2671 = vmatpush1.bf16.msra.mxu0 %v2670_v6  ;;  %v2680_v6 = vpack.c.bf16 %v1373_v62, %v1369_v58 }
 0x19d   :  { %2799 = vmatpush1.bf16.msra.mxu1 %v2798_v8  ;;  %2673 = vmatprep.subr.bf16.mxu0 %v2672_v12  ;;  %v1370_v8 = vld [vmem:[#allocation8 + $0x490] sm:$0xff]  ;;  %v1379_v12 = vld [vmem:[#allocation8 + $0x4d8] sm:$0xff] }
 0x19e   :  { %2801 = vmatprep.subr.bf16.mxu1 %v2800_v14  ;;  %v2682_v14 = vpack.c.bf16 %v1372_v5, %v1368_v4  ;;  %v2810_v15 = vpack.c.bf16 %v1374_v9, %v1370_v8  ;;  %v1415_v4 = vld [vmem:[#allocation8 + $0x5f8] sm:$0xff]  ;;  %v623_v5 = vrot.slane %v3222_v18, %v622_v56  ;;  %v1408_v8 = vld [vmem:[#allocation8 + $0x5c0] sm:$0xff] }
 0x19f   :  { %v1412_v9 = vld [vmem:[#allocation8 + $0x5e0] sm:$0xff] }
 0x1a0   :  { %v2702_v18 = vpack.c.bf16 %v1412_v9, %v1408_v8  ;;  %v1451_v8 = vld [vmem:[#allocation8 + $0x718] sm:$0xff] }
 0x1a1   :  { %v1455_v9 = vld [vmem:[#allocation8 + $0x738] sm:$0xff] }
 0x232   :  { %v911_v24 = vpop.f32.mrb[0].mxu0 }
 0x233   :  { %v2928_v25 = vadd.f32 %v911_v24, %v615_v21  ;;  %v3235_v26 = vpop.f32.mrb[0].mxu1  ;;  %v913_v27 = vpop.f32.mrb[1].mxu0  ;;  %v1376_v21 = vld [vmem:[#allocation8 + $0x4c0] sm:$0xff]  ;;  %v2812_v24 = vpack.c.bf16 %v1383_v13, %v1379_v12  ;;  %v1410_v12 = vld [vmem:[#allocation8 + $0x5d0] sm:$0xff] }
 0x234   :  { %v2929_v28 = vadd.f32 %v913_v27, %v619_v22  ;;  %v1197_v29 = vpop.f32.mrb[1].mxu1  ;;  %v1380_v22 = vld [vmem:[#allocation8 + $0x4e0] sm:$0xff]  ;;  %v1382_v27 = vld [vmem:[#allocation8 + $0x4f0] sm:$0xff] }
 0x235   :  { %v1200_v30 = vsub.f32 0.0, %v2928_v25  ;;  %v2931_v31 = vadd.f32 %v1197_v29, %v627_v23  ;;  %v2684_v23 = vpack.c.bf16 %v1381_v11, %v1377_v10  ;;  %v1378_v25 = vld [vmem:[#allocation8 + $0x4d0] sm:$0xff]  ;;  %v1389_v29 = vld [vmem:[#allocation8 + $0x528] sm:$0xff] }
 0x236   :  { %v1201_v32 = vsub.f32 0.0, %v2929_v28  ;;  %v1385_v28 = vld [vmem:[#allocation8 + $0x508] sm:$0xff]  ;;  %v1414_v13 = vld [vmem:[#allocation8 + $0x5f0] sm:$0xff] }
 0x237   :  { %v1204_v33 = vmul.f32 1.442695, %v1200_v30  ;;  %v1203_v34 = vsub.f32 0.0, %v2931_v31  ;;  %v1387_v30 = vld [vmem:[#allocation8 + $0x518] sm:$0xff] }
 0x238   :  { %v1206_v35 = vmul.f32 1.442695, %v1201_v32  ;;  %v1391_v31 = vld [vmem:[#allocation8 + $0x538] sm:$0xff]  ;;  %v2686_v32 = vpack.c.bf16 %v1380_v22, %v1376_v21 }
 0x239   :  { %2961 = vpow2.f32 %v1204_v33  ;;  %v1210_v36 = vmul.f32 1.442695, %v1203_v34  ;;  %v2814_v33 = vpack.c.bf16 %v1382_v27, %v1378_v25  ;;  %v1384_v34 = vld [vmem:[#allocation8 + $0x500] sm:$0xff]  ;;  %v1419_v21 = vld [vmem:[#allocation8 + $0x618] sm:$0xff] }
 0x23a   :  { %2963 = vpow2.f32 %v1206_v35  ;;  %v1388_v35 = vld [vmem:[#allocation8 + $0x520] sm:$0xff]  ;;  %v1423_v22 = vld [vmem:[#allocation8 + $0x638] sm:$0xff] }
 0x23b   :  { %2965 = vpow2.f32 %v1210_v36  ;;  %v2688_v36 = vpack.c.bf16 %v1389_v29, %v1385_v28  ;;  %v2690_v44 = vpack.c.bf16 %v1388_v35, %v1384_v34  ;;  %v1416_v25 = vld [vmem:[#allocation8 + $0x600] sm:$0xff]  ;;  %v2832_v29 = vpack.c.bf16 %v1423_v22, %v1419_v21  ;;  %v1427_v34 = vld [vmem:[#allocation8 + $0x658] sm:$0xff]  ;;  %v1450_v21 = vld [vmem:[#allocation8 + $0x710] sm:$0xff] }
 0x23c   :  { %v1420_v27 = vld [vmem:[#allocation8 + $0x620] sm:$0xff]  ;;  %v1431_v35 = vld [vmem:[#allocation8 + $0x678] sm:$0xff]  ;;  %v1454_v22 = vld [vmem:[#allocation8 + $0x730] sm:$0xff] }
 0x243   :  { %v2962_v37 = vpop.eup %2961 }
 0x244   :  { %v2964_v38 = vpop.eup %2963  ;;  %v1212_v39 = vadd.f32 1.0, %v2962_v37  ;;  %v2816_v37 = vpack.c.bf16 %v1391_v31, %v1387_v30  ;;  %v1418_v30 = vld [vmem:[#allocation8 + $0x610] sm:$0xff] }
 0x245   :  { %v2966_v40 = vpop.eup %2965  ;;  %v1213_v41 = vadd.f32 1.0, %v2964_v38  ;;  %v1386_v38 = vld [vmem:[#allocation8 + $0x510] sm:$0xff] }
 0x246   :  { %v1215_v42 = vadd.f32 1.0, %v2966_v40  ;;  %v1393_v40 = vld [vmem:[#allocation8 + $0x548] sm:$0xff]  ;;  %v1422_v31 = vld [vmem:[#allocation8 + $0x630] sm:$0xff] }
 0x247   :  { %2967 = vrcp.f32 %v1213_v41  ;;  %v1397_v41 = vld [vmem:[#allocation8 + $0x568] sm:$0xff] }
 0x248   :  { %2969 = vrcp.f32 %v1212_v39  ;;  %v1390_v39 = vld [vmem:[#allocation8 + $0x530] sm:$0xff]  ;;  %v2692_v48 = vpack.c.bf16 %v1397_v41, %v1393_v40  ;;  %v2836_v41 = vpack.c.bf16 %v1431_v35, %v1427_v34 }
 0x249   :  { %2971 = vrcp.f32 %v1215_v42  ;;  %v1395_v42 = vld [vmem:[#allocation8 + $0x558] sm:$0xff]  ;;  %v2818_v45 = vpack.c.bf16 %v1390_v39, %v1386_v38  ;;  %v1424_v38 = vld [vmem:[#allocation8 + $0x640] sm:$0xff]  ;;  %v1458_v34 = vld [vmem:[#allocation8 + $0x750] sm:$0xff] }
 0x24a   :  { %v2820_v49 = vpack.c.bf16 %v1399_v43, %v1395_v42  ;;  %v1428_v39 = vld [vmem:[#allocation8 + $0x660] sm:$0xff]  ;;  %v1426_v42 = vld [vmem:[#allocation8 + $0x650] sm:$0xff] }
 0x24b   :  { %v1430_v43 = vld [vmem:[#allocation8 + $0x670] sm:$0xff] }
 0x24c   :  { %v1462_v35 = vld [vmem:[#allocation8 + $0x770] sm:$0xff] }
 0x251   :  { %v2968_v55 = vpop.eup %2967 }
 0x252   :  { %v2970_v59 = vpop.eup %2969  ;;  %1566 = vmatprep.mubr.f32.mxu0 %v2968_v55  ;;  %1708 = vmatprep.mubr.f32.mxu1 %v2968_v55  ;;  %v1407_v55 = vld [vmem:[#allocation8 + $0x5b8] sm:$0xff] }
 0x253   :  { %1567 = vmatmul.mubr.f32.vlgmr.msra.gmra.mrb[2].mxu0 %v2970_v59  ;;  %1709 = vmatmul.mubr.f32.vlgmr.msra.gmra.mrb[2].mxu1 %v2970_v59  ;;  %v2972_v1 = vpop.eup %2971  ;;  %v1400_v59 = vld [vmem:[#allocation8 + $0x580] sm:$0xff]  ;;  %v2824_v62 = vpack.c.bf16 %v1407_v55, %v1403_v54  ;;  %v2840_v54 = vpack.c.bf16 %v1439_v47, %v1435_v46  ;;  %v1434_v55 = vld [vmem:[#allocation8 + $0x690] sm:$0xff] }
 0x254   :  { %2675 = vmatpush1.bf16.msra.mxu0 %v2674_v51  ;;  %2803 = vmatpush1.bf16.msra.mxu1 %v2802_v52  ;;  %v1398_v51 = vld [vmem:[#allocation8 + $0x570] sm:$0xff]  ;;  %v1401_v52 = vld [vmem:[#allocation8 + $0x588] sm:$0xff] }
 0x255   :  { %1637 = vmatprep.mubr.f32.mxu0 %v2972_v1  ;;  %1779 = vmatprep.mubr.f32.mxu1 %v2972_v1  ;;  %v2822_v58 = vpack.c.bf16 %v1398_v51, %v1394_v50  ;;  %v1409_v1 = vld [vmem:[#allocation8 + $0x5c8] sm:$0xff]  ;;  %v2838_v50 = vpack.c.bf16 %v1430_v43, %v1426_v42  ;;  %v1432_v51 = vld [vmem:[#allocation8 + $0x680] sm:$0xff]  ;;  %v1466_v46 = vld [vmem:[#allocation8 + $0x790] sm:$0xff] }
 0x256   :  { %2677 = vmatprep.subr.bf16.mxu0 %v2676_v60  ;;  %2805 = vmatprep.subr.bf16.mxu1 %v2804_v61  ;;  %v1404_v60 = vld [vmem:[#allocation8 + $0x5a0] sm:$0xff]  ;;  %v2696_v61 = vpack.c.bf16 %v1405_v53, %v1401_v52  ;;  %v1470_v47 = vld [vmem:[#allocation8 + $0x7b0] sm:$0xff] }
 0x257   :  { %v1436_v52 = vld [vmem:[#allocation8 + $0x6a0] sm:$0xff] }
 0x258   :  { %2679 = vmatpush1.bf16.msra.mxu0 %v2678_v2  ;;  %2807 = vmatpush1.bf16.msra.mxu1 %v2806_v3  ;;  %v1413_v2 = vld [vmem:[#allocation8 + $0x5e8] sm:$0xff]  ;;  %v1411_v3 = vld [vmem:[#allocation8 + $0x5d8] sm:$0xff]  ;;  %v1464_v42 = vld [vmem:[#allocation8 + $0x780] sm:$0xff] }
 0x259   :  { %2681 = vmatprep.subr.bf16.mxu0 %v2680_v6  ;;  %2809 = vmatprep.subr.bf16.mxu1 %v2808_v7  ;;  %v2698_v6 = vpack.c.bf16 %v1404_v60, %v1400_v59  ;;  %v2826_v7 = vpack.c.bf16 %v1406_v0, %v1402_v63  ;;  %v2700_v10 = vpack.c.bf16 %v1413_v2, %v1409_v1  ;;  %v1445_v59 = vld [vmem:[#allocation8 + $0x6e8] sm:$0xff]  ;;  %v1443_v60 = vld [vmem:[#allocation8 + $0x6d8] sm:$0xff]  ;;  %v1440_v0 = vld [vmem:[#allocation8 + $0x6c0] sm:$0xff] }
 0x25a   :  { %v2828_v11 = vpack.c.bf16 %v1415_v4, %v1411_v3  ;;  %v1444_v1 = vld [vmem:[#allocation8 + $0x6e0] sm:$0xff]  ;;  %v1442_v4 = vld [vmem:[#allocation8 + $0x6d0] sm:$0xff] }
 0x25b   :  { %v1468_v43 = vld [vmem:[#allocation8 + $0x7a0] sm:$0xff] }
 0x25c   :  { %2683 = vmatpush1.bf16.msra.mxu0 %v2682_v14  ;;  %2811 = vmatpush1.bf16.msra.mxu1 %v2810_v15  ;;  %v1417_v14 = vld [vmem:[#allocation8 + $0x608] sm:$0xff] }
 0x25d   :  { %2685 = vmatprep.subr.bf16.mxu0 %v2684_v23  ;;  %2813 = vmatprep.subr.bf16.mxu1 %v2812_v24  ;;  %v1421_v15 = vld [vmem:[#allocation8 + $0x628] sm:$0xff]  ;;  %v2930_v23 = vadd.f32 %v3235_v26, %v623_v5  ;;  %v2830_v24 = vpack.c.bf16 %v1414_v13, %v1410_v12  ;;  %v2706_v26 = vpack.c.bf16 %v1420_v27, %v1416_v25  ;;  %v1446_v5 = vld [vmem:[#allocation8 + $0x6f0] sm:$0xff]  ;;  %v1448_v12 = vld [vmem:[#allocation8 + $0x700] sm:$0xff] }
 0x25e   :  { %v2704_v28 = vpack.c.bf16 %v1421_v15, %v1417_v14  ;;  %v1452_v13 = vld [vmem:[#allocation8 + $0x720] sm:$0xff]  ;;  %v2848_v15 = vpack.c.bf16 %v1455_v9, %v1451_v8  ;;  %v1463_v25 = vld [vmem:[#allocation8 + $0x778] sm:$0xff] }
 0x25f   :  { %v2722_v27 = vpack.c.bf16 %v1452_v13, %v1448_v12  ;;  %v1842_v9 = vld [vmem:[%s3450_s5 + $0x100] sm:$0xff]  ;;  %v1828_v12 = vld [vmem:[%s3450_s5 + $0x90] sm:$0xff]  ;;  %v1829_v13 = vld [vmem:[%s3450_s5 + $0x98] sm:$0xff] }
 0x260   :  { %2687 = vmatpush1.bf16.msra.mxu0 %v2686_v32  ;;  %2815 = vmatpush1.bf16.msra.mxu1 %v2814_v33  ;;  %v1425_v32 = vld [vmem:[#allocation8 + $0x648] sm:$0xff] }
 0x261   :  { %2689 = vmatprep.subr.bf16.mxu0 %v2688_v36  ;;  %2817 = vmatprep.subr.bf16.mxu1 %v2816_v37  ;;  %v1429_v33 = vld [vmem:[#allocation8 + $0x668] sm:$0xff]  ;;  %v1202_v36 = vsub.f32 0.0, %v2930_v23  ;;  %v2834_v37 = vpack.c.bf16 %v1422_v31, %v1418_v30  ;;  %v1460_v30 = vld [vmem:[#allocation8 + $0x760] sm:$0xff] }
 0x262   :  { %v2708_v40 = vpack.c.bf16 %v1429_v33, %v1425_v32  ;;  %v1457_v23 = vld [vmem:[#allocation8 + $0x748] sm:$0xff] }
 0x264   :  { %2691 = vmatpush1.bf16.msra.mxu0 %v2690_v44  ;;  %2819 = vmatpush1.bf16.msra.mxu1 %v2818_v45  ;;  %v1433_v44 = vld [vmem:[#allocation8 + $0x688] sm:$0xff] }
 0x265   :  { %2693 = vmatprep.subr.bf16.mxu0 %v2692_v48  ;;  %2821 = vmatprep.subr.bf16.mxu1 %v2820_v49  ;;  %v1437_v45 = vld [vmem:[#allocation8 + $0x6a8] sm:$0xff]  ;;  %v1208_v48 = vmul.f32 1.442695, %v1202_v36  ;;  %v2710_v49 = vpack.c.bf16 %v1428_v39, %v1424_v38  ;;  %v1471_v38 = vld [vmem:[#allocation8 + $0x7b8] sm:$0xff] }
 0x266   :  { %v2712_v53 = vpack.c.bf16 %v1437_v45, %v1433_v44  ;;  %v1465_v36 = vld [vmem:[#allocation8 + $0x788] sm:$0xff] }
 0x267   :  { %2973 = vpow2.f32 %v1208_v48  ;;  %v1473_v48 = vld [vmem:[#allocation8 + $0x7c8] sm:$0xff] }
 0x268   :  { %2695 = vmatpush1.bf16.msra.mxu0 %v2694_v57  ;;  %2823 = vmatpush1.bf16.msra.mxu1 %v2822_v58  ;;  %v1438_v57 = vld [vmem:[#allocation8 + $0x6b0] sm:$0xff]  ;;  %v1441_v58 = vld [vmem:[#allocation8 + $0x6c8] sm:$0xff] }
 0x269   :  { %2697 = vmatprep.subr.bf16.mxu0 %v2696_v61  ;;  %2825 = vmatprep.subr.bf16.mxu1 %v2824_v62  ;;  %v1447_v61 = vld [vmem:[#allocation8 + $0x6f8] sm:$0xff]  ;;  %v2714_v62 = vpack.c.bf16 %v1436_v52, %v1432_v51  ;;  %v2842_v63 = vpack.c.bf16 %v1438_v57, %v1434_v55  ;;  %v2716_v2 = vpack.c.bf16 %v1445_v59, %v1441_v58  ;;  %v1476_v58 = vld [vmem:[#allocation8 + $0x7e0] sm:$0xff]  ;;  %v1474_v59 = vld [vmem:[#allocation8 + $0x7d0] sm:$0xff] }
 0x26a   :  { %v2844_v3 = vpack.c.bf16 %v1447_v61, %v1443_v60  ;;  %v1479_v51 = vld [vmem:[#allocation8 + $0x7f8] sm:$0xff]  ;;  %v2730_v52 = vpack.c.bf16 %v1468_v43, %v1464_v42  ;;  %v1478_v60 = vld [vmem:[#allocation8 + $0x7f0] sm:$0xff] }
 0x26b   :  { %v1864_v42 = vld [vmem:[%s3450_s5 + $0x1b0] sm:$0xff] }
 0x26c   :  { %2699 = vmatpush1.bf16.msra.mxu0 %v2698_v6  ;;  %2827 = vmatpush1.bf16.msra.mxu1 %v2826_v7  ;;  %v1449_v6 = vld [vmem:[#allocation8 + $0x708] sm:$0xff] }
 0x26d   :  { %2701 = vmatprep.subr.bf16.mxu0 %v2700_v10  ;;  %2829 = vmatprep.subr.bf16.mxu1 %v2828_v11  ;;  %v1453_v7 = vld [vmem:[#allocation8 + $0x728] sm:$0xff]  ;;  %v2718_v10 = vpack.c.bf16 %v1444_v1, %v1440_v0  ;;  %v2846_v11 = vpack.c.bf16 %v1446_v5, %v1442_v4  ;;  %v1826_v0 = vld [vmem:[%s3450_s5 + $0x80] sm:$0xff] }
 0x26e   :  { %v2720_v14 = vpack.c.bf16 %v1453_v7, %v1449_v6  ;;  %v1827_v1 = vld [vmem:[%s3450_s5 + $0x88] sm:$0xff]  ;;  %v1810_v5 = vld [vmem:[%s3450_s5] sm:$0xff] }
 0x26f   :  { %v1859_v4 = vld [vmem:[%s3450_s5 + $0x188] sm:$0xff] }
 0x270   :  { %2703 = vmatpush1.bf16.msra.mxu0 %v2702_v18  ;;  %2831 = vmatpush1.bf16.msra.mxu1 %v2830_v24  ;;  %v1461_v18 = vld [vmem:[#allocation8 + $0x768] sm:$0xff]  ;;  %v1459_v24 = vld [vmem:[#allocation8 + $0x758] sm:$0xff] }
 0x271   :  { %2705 = vmatprep.subr.bf16.mxu0 %v2704_v28  ;;  %2833 = vmatprep.subr.bf16.mxu1 %v2832_v29  ;;  %v2850_v28 = vpack.c.bf16 %v1454_v22, %v1450_v21  ;;  %v1456_v29 = vld [vmem:[#allocation8 + $0x740] sm:$0xff]  ;;  %v2974_v31 = vpop.eup %2973  ;;  %v2724_v32 = vpack.c.bf16 %v1461_v18, %v1457_v23  ;;  %v2852_v33 = vpack.c.bf16 %v1463_v25, %v1459_v24  ;;  %v1861_v21 = vld [vmem:[%s3450_s5 + $0x198] sm:$0xff]  ;;  %v1812_v22 = vld [vmem:[%s3450_s5 + $0x10] sm:$0xff] }
 0x272   :  { %v1214_v39 = vadd.f32 1.0, %v2974_v31  ;;  %v1811_v6 = vld [vmem:[%s3450_s5 + $0x8] sm:$0xff]  ;;  %v1813_v23 = vld [vmem:[%s3450_s5 + $0x18] sm:$0xff]  ;;  %v1844_v25 = vld [vmem:[%s3450_s5 + $0x110] sm:$0xff] }
 0x273   :  { %v2866_v8 = vpack.c.bf16 %v1811_v6, %v1810_v5  ;;  %v2870_v24 = vpack.c.bf16 %v1813_v23, %v1812_v22  ;;  %v1862_v31 = vld [vmem:[%s3450_s5 + $0x1a0] sm:$0xff]  ;;  %v1869_v5 = vld [vmem:[%s3450_s5 + $0x1d8] sm:$0xff]  ;;  %v1820_v6 = vld [vmem:[%s3450_s5 + $0x50] sm:$0xff] }
 0x274   :  { %2707 = vmatpush1.bf16.msra.mxu0 %v2706_v26  ;;  %2835 = vmatpush1.bf16.msra.mxu1 %v2834_v37  ;;  %v1469_v26 = vld [vmem:[#allocation8 + $0x7a8] sm:$0xff]  ;;  %v1467_v37 = vld [vmem:[#allocation8 + $0x798] sm:$0xff]  ;;  %2975 = vrcp.f32 %v1214_v39 }
 0x275   :  { %2709 = vmatprep.subr.bf16.mxu0 %v2708_v40  ;;  %2837 = vmatprep.subr.bf16.mxu1 %v2836_v41  ;;  %v2726_v40 = vpack.c.bf16 %v1460_v30, %v1456_v29  ;;  %v2854_v41 = vpack.c.bf16 %v1462_v35, %v1458_v34  ;;  %v2728_v44 = vpack.c.bf16 %v1469_v26, %v1465_v36  ;;  %v1830_v29 = vld [vmem:[%s3450_s5 + $0xa0] sm:$0xff]  ;;  %v1831_v30 = vld [vmem:[%s3450_s5 + $0xa8] sm:$0xff] }
 0x276   :  { %v2856_v45 = vpack.c.bf16 %v1471_v38, %v1467_v37  ;;  %v1814_v34 = vld [vmem:[%s3450_s5 + $0x20] sm:$0xff]  ;;  %v1815_v35 = vld [vmem:[%s3450_s5 + $0x28] sm:$0xff] }
 0x277   :  { %v2874_v26 = vpack.c.bf16 %v1815_v35, %v1814_v34  ;;  %v1846_v37 = vld [vmem:[%s3450_s5 + $0x120] sm:$0xff]  ;;  %v1847_v38 = vld [vmem:[%s3450_s5 + $0x128] sm:$0xff] }
 0x278   :  { %2711 = vmatpush1.bf16.msra.mxu0 %v2710_v49  ;;  %2839 = vmatpush1.bf16.msra.mxu1 %v2838_v50  ;;  %v1477_v49 = vld [vmem:[#allocation8 + $0x7e8] sm:$0xff]  ;;  %v1475_v50 = vld [vmem:[#allocation8 + $0x7d8] sm:$0xff]  ;;  %v2906_v39 = vpack.c.bf16 %v1847_v38, %v1846_v37 }
 0x279   :  { %2713 = vmatprep.subr.bf16.mxu0 %v2712_v53  ;;  %2841 = vmatprep.subr.bf16.mxu1 %v2840_v54  ;;  %v2858_v53 = vpack.c.bf16 %v1470_v47, %v1466_v46  ;;  %v1472_v54 = vld [vmem:[#allocation8 + $0x7c0] sm:$0xff]  ;;  %v2732_v55 = vpack.c.bf16 %v1477_v49, %v1473_v48  ;;  %v2860_v57 = vpack.c.bf16 %v1479_v51, %v1475_v50  ;;  %v1817_v46 = vld [vmem:[%s3450_s5 + $0x38] sm:$0xff]  ;;  %v1848_v49 = vld [vmem:[%s3450_s5 + $0x130] sm:$0xff] }
 0x27a   :  { %v2734_v61 = vpack.c.bf16 %v1476_v58, %v1472_v54  ;;  %v1849_v50 = vld [vmem:[%s3450_s5 + $0x138] sm:$0xff]  ;;  %v1866_v54 = vld [vmem:[%s3450_s5 + $0x1c0] sm:$0xff]  ;;  %v1871_v22 = vld [vmem:[%s3450_s5 + $0x1e8] sm:$0xff] }
 0x27b   :  { %v2910_v51 = vpack.c.bf16 %v1849_v50, %v1848_v49  ;;  %v1818_v58 = vld [vmem:[%s3450_s5 + $0x40] sm:$0xff]  ;;  %v1856_v37 = vld [vmem:[%s3450_s5 + $0x170] sm:$0xff] }
 0x27c   :  { %2715 = vmatpush1.bf16.msra.mxu0 %v2714_v62  ;;  %2843 = vmatpush1.bf16.msra.mxu1 %v2842_v63  ;;  %v2862_v62 = vpack.c.bf16 %v1478_v60, %v1474_v59  ;;  %v1819_v59 = vld [vmem:[%s3450_s5 + $0x48] sm:$0xff]  ;;  %v1822_v23 = vld [vmem:[%s3450_s5 + $0x60] sm:$0xff] }
 0x27d   :  { %2717 = vmatprep.subr.bf16.mxu0 %v2716_v2  ;;  %2845 = vmatprep.subr.bf16.mxu1 %v2844_v3  ;;  %v1858_v2 = vld [vmem:[%s3450_s5 + $0x180] sm:$0xff]  ;;  %v2864_v3 = vpack.c.bf16 %v1827_v1, %v1826_v0  ;;  %v1836_v1 = vld [vmem:[%s3450_s5 + $0xd0] sm:$0xff] }
 0x27e   :  { %v2976_v63 = vpop.eup %2975  ;;  %v2896_v7 = vpack.c.bf16 %v1859_v4, %v1858_v2  ;;  %v1837_v2 = vld [vmem:[%s3450_s5 + $0xd8] sm:$0xff] }
 0x27f   :  { %v2884_v4 = vpack.c.bf16 %v1837_v2, %v1836_v1 }
 0x280   :  { %2719 = vmatpush1.bf16.msra.mxu0 %v2718_v10  ;;  %2847 = vmatpush1.bf16.msra.mxu1 %v2846_v11  ;;  %v1843_v10 = vld [vmem:[%s3450_s5 + $0x108] sm:$0xff] }
 0x281   :  { %2721 = vmatprep.subr.bf16.mxu0 %v2720_v14  ;;  %2849 = vmatprep.subr.bf16.mxu1 %v2848_v15  ;;  %v2898_v11 = vpack.c.bf16 %v1843_v10, %v1842_v9  ;;  %v1860_v14 = vld [vmem:[%s3450_s5 + $0x190] sm:$0xff]  ;;  %v2868_v15 = vpack.c.bf16 %v1829_v13, %v1828_v12  ;;  %v1838_v13 = vld [vmem:[%s3450_s5 + $0xe0] sm:$0xff] }
 0x282   :  { %v2900_v18 = vpack.c.bf16 %v1861_v21, %v1860_v14  ;;  %v1852_v10 = vld [vmem:[%s3450_s5 + $0x150] sm:$0xff]  ;;  %v1839_v14 = vld [vmem:[%s3450_s5 + $0xe8] sm:$0xff] }
 0x283   :  { %v2888_v21 = vpack.c.bf16 %v1839_v14, %v1838_v13 }
 0x284   :  { %2723 = vmatpush1.bf16.msra.mxu0 %v2722_v27  ;;  %2851 = vmatpush1.bf16.msra.mxu1 %v2850_v28  ;;  %v1845_v27 = vld [vmem:[%s3450_s5 + $0x118] sm:$0xff] }
 0x285   :  { %2725 = vmatprep.subr.bf16.mxu0 %v2724_v32  ;;  %2853 = vmatprep.subr.bf16.mxu1 %v2852_v33  ;;  %v2902_v28 = vpack.c.bf16 %v1845_v27, %v1844_v25  ;;  %v2872_v32 = vpack.c.bf16 %v1831_v30, %v1830_v29  ;;  %v1863_v33 = vld [vmem:[%s3450_s5 + $0x1a8] sm:$0xff]  ;;  %v1854_v27 = vld [vmem:[%s3450_s5 + $0x160] sm:$0xff]  ;;  %v1840_v29 = vld [vmem:[%s3450_s5 + $0xf0] sm:$0xff] }
 0x286   :  { %v2904_v36 = vpack.c.bf16 %v1863_v33, %v1862_v31  ;;  %v1841_v31 = vld [vmem:[%s3450_s5 + $0xf8] sm:$0xff] }
 0x287   :  { %v1873_v33 = vld [vmem:[%s3450_s5 + $0x1f8] sm:$0xff]  ;;  %v2892_v34 = vpack.c.bf16 %v1841_v31, %v1840_v29 }
 0x288   :  { %2727 = vmatpush1.bf16.msra.mxu0 %v2726_v40  ;;  %2855 = vmatpush1.bf16.msra.mxu1 %v2854_v41  ;;  %v1832_v40 = vld [vmem:[%s3450_s5 + $0xb0] sm:$0xff]  ;;  %v1833_v41 = vld [vmem:[%s3450_s5 + $0xb8] sm:$0xff] }
 0x289   :  { %2729 = vmatprep.subr.bf16.mxu0 %v2728_v44  ;;  %2857 = vmatprep.subr.bf16.mxu1 %v2856_v45  ;;  %v2876_v43 = vpack.c.bf16 %v1833_v41, %v1832_v40  ;;  %v1865_v44 = vld [vmem:[%s3450_s5 + $0x1b8] sm:$0xff]  ;;  %v1816_v45 = vld [vmem:[%s3450_s5 + $0x30] sm:$0xff]  ;;  %v1874_v41 = vld [vmem:[#allocation2] sm:$0x1] }
 0x28a   :  { %v2908_v47 = vpack.c.bf16 %v1865_v44, %v1864_v42  ;;  %v2878_v48 = vpack.c.bf16 %v1817_v46, %v1816_v45  ;;  %2952 = vpush %v1874_v41  ;;  %v1480_v42 = vld [vmem:[#allocation10] sm:$0xf] }
 0x28b   :  { %v1493_v44 = vrot.slane %v1480_v42, %v622_v56  ;;  %v1489_v45 = vrot.slane %v1480_v42, %v618_v19  ;;  %v1497_v46 = vrot.slane %v1480_v42, %v626_v20 }
 0x28c   :  { %2731 = vmatpush1.bf16.msra.mxu0 %v2730_v52  ;;  %2859 = vmatpush1.bf16.msra.mxu1 %v2858_v53  ;;  %v1834_v52 = vld [vmem:[%s3450_s5 + $0xc0] sm:$0xff]  ;;  %v1835_v53 = vld [vmem:[%s3450_s5 + $0xc8] sm:$0xff] }
 0x28d   :  { %2733 = vmatprep.subr.bf16.mxu0 %v2732_v55  ;;  %2861 = vmatprep.subr.bf16.mxu1 %v2860_v57  ;;  %v2880_v55 = vpack.c.bf16 %v1835_v53, %v1834_v52  ;;  %v1867_v57 = vld [vmem:[%s3450_s5 + $0x1c8] sm:$0xff] }
 0x28e   :  { %v2912_v60 = vpack.c.bf16 %v1867_v57, %v1866_v54 }
 0x290   :  { %2735 = vmatpush1.bf16.msra.mxu0 %v2734_v61  ;;  %2863 = vmatpush1.bf16.msra.mxu1 %v2862_v62  ;;  %v2882_v61 = vpack.c.bf16 %v1819_v59, %v1818_v58  ;;  %v1850_v62 = vld [vmem:[%s3450_s5 + $0x140] sm:$0xff] }
 0x291   :  { %2865 = vmatprep.subr.bf16.mxu0 %v2864_v3  ;;  %2897 = vmatprep.subr.bf16.mxu1 %v2896_v7  ;;  %v1868_v3 = vld [vmem:[%s3450_s5 + $0x1d0] sm:$0xff]  ;;  %v1821_v7 = vld [vmem:[%s3450_s5 + $0x58] sm:$0xff] }
 0x292   :  { %v2886_v9 = vpack.c.bf16 %v1821_v7, %v1820_v6 }
 0x293   :  { %1638 = vmatmul.mubr.f32.vlgmr.msra.gmra.mrb[2].mxu0 %v2976_v63  ;;  %1780 = vmatmul.mubr.f32.vlgmr.msra.gmra.mrb[2].mxu1 %v2976_v63  ;;  %v1851_v63 = vld [vmem:[%s3450_s5 + $0x148] sm:$0xff] }
 0x294   :  { %2867 = vmatpush3.bf16.msra.mxu0 %v2866_v8  ;;  %2899 = vmatpush3.bf16.msra.mxu1 %v2898_v11  ;;  %v2914_v0 = vpack.c.bf16 %v1851_v63, %v1850_v62  ;;  %v2916_v8 = vpack.c.bf16 %v1869_v5, %v1868_v3  ;;  %v1853_v11 = vld [vmem:[%s3450_s5 + $0x158] sm:$0xff] }
 0x295   :  { %2869 = vmatprep.subr.bf16.mxu0 %v2868_v15  ;;  %2901 = vmatprep.subr.bf16.mxu1 %v2900_v18  ;;  %v2918_v12 = vpack.c.bf16 %v1853_v11, %v1852_v10  ;;  %v1870_v15 = vld [vmem:[%s3450_s5 + $0x1e0] sm:$0xff]  ;;  %v1823_v18 = vld [vmem:[%s3450_s5 + $0x68] sm:$0xff] }
 0x296   :  { %v2890_v25 = vpack.c.bf16 %v1823_v18, %v1822_v23 }
 0x298   :  { %2871 = vmatpush3.bf16.msra.mxu0 %v2870_v24  ;;  %2903 = vmatpush3.bf16.msra.mxu1 %v2902_v28  ;;  %v2920_v24 = vpack.c.bf16 %v1871_v22, %v1870_v15  ;;  %v1855_v28 = vld [vmem:[%s3450_s5 + $0x168] sm:$0xff] }
 0x299   :  { %2873 = vmatprep.subr.bf16.mxu0 %v2872_v32  ;;  %2905 = vmatprep.subr.bf16.mxu1 %v2904_v36  ;;  %v2922_v30 = vpack.c.bf16 %v1855_v28, %v1854_v27  ;;  %v1872_v32 = vld [vmem:[%s3450_s5 + $0x1f0] sm:$0xff] }
 0x29a   :  { %v2924_v35 = vpack.c.bf16 %v1873_v33, %v1872_v32  ;;  %v1824_v36 = vld [vmem:[%s3450_s5 + $0x70] sm:$0xff] }
 0x29c   :  { %2875 = vmatpush3.bf16.msra.mxu0 %v2874_v26  ;;  %2907 = vmatpush3.bf16.msra.mxu1 %v2906_v39  ;;  %v1825_v26 = vld [vmem:[%s3450_s5 + $0x78] sm:$0xff] }
 0x29d   :  { %2877 = vmatprep.subr.bf16.mxu0 %v2876_v43  ;;  %2909 = vmatprep.subr.bf16.mxu1 %v2908_v47  ;;  %v2894_v38 = vpack.c.bf16 %v1825_v26, %v1824_v36  ;;  %v1857_v39 = vld [vmem:[%s3450_s5 + $0x178] sm:$0xff]  ;;  %v1485_v43 = vrot.slane %v1480_v42, %v614_v17 }
 0x29e   :  { %v2926_v40 = vpack.c.bf16 %v1857_v39, %v1856_v37 }
 0x2a0   :  { %2879 = vmatpush3.bf16.msra.mxu0 %v2878_v48  ;;  %2911 = vmatpush3.bf16.msra.mxu1 %v2910_v51 }
 0x2a1   :  { %2881 = vmatprep.subr.bf16.mxu0 %v2880_v55  ;;  %2913 = vmatprep.subr.bf16.mxu1 %v2912_v60 }
 0x2a4   :  { %2883 = vmatpush3.bf16.msra.mxu0 %v2882_v61  ;;  %2915 = vmatpush3.bf16.msra.mxu1 %v2914_v0 }
 0x2a5   :  { %2885 = vmatprep.subr.bf16.mxu0 %v2884_v4  ;;  %2917 = vmatprep.subr.bf16.mxu1 %v2916_v8 }
 0x2a8   :  { %2887 = vmatpush3.bf16.msra.mxu0 %v2886_v9  ;;  %2919 = vmatpush3.bf16.msra.mxu1 %v2918_v12 }
 0x2a9   :  { %2889 = vmatprep.subr.bf16.mxu0 %v2888_v21  ;;  %2921 = vmatprep.subr.bf16.mxu1 %v2920_v24 }
 0x2ac   :  { %2891 = vmatpush3.bf16.msra.mxu0 %v2890_v25  ;;  %2923 = vmatpush3.bf16.msra.mxu1 %v2922_v30 }
 0x2ad   :  { %2893 = vmatprep.subr.bf16.mxu0 %v2892_v34  ;;  %2925 = vmatprep.subr.bf16.mxu1 %v2924_v35 }
 0x2b0   :  { %2895 = vmatpush3.bf16.msra.mxu0 %v2894_v38  ;;  %2927 = vmatpush3.bf16.msra.mxu1 %v2926_v40 }
 0x2bb   :  { %s2953_s5 = spop %2952 }
 0x2bc   :  { %v1876_v10 = vstv %s2953_s5 }
 0x366   :  { %v1639_v47 = vpop.f32.mrb[2].mxu0  ;;  %v1781_v48 = vpop.f32.mrb[2].mxu1 }
 0x367   :  { %v2932_v49 = vadd.f32 %v1639_v47, %v1485_v43  ;;  %v2934_v50 = vadd.f32 %v1781_v48, %v1493_v44  ;;  %v1641_v51 = vpop.f32.mrb[3].mxu0  ;;  %v1783_v52 = vpop.f32.mrb[3].mxu1 }
 0x368   :  { %v2933_v53 = vadd.f32 %v1641_v51, %v1489_v45  ;;  %v2935_v54 = vadd.f32 %v1783_v52, %v1497_v46 }
 0x369   :  { %v1786_v55 = vsub.f32 0.0, %v2932_v49  ;;  %v1788_v57 = vsub.f32 0.0, %v2934_v50 }
 0x36a   :  { %v1787_v17 = vsub.f32 0.0, %v2933_v53  ;;  %v1789_v58 = vsub.f32 0.0, %v2935_v54 }
 0x36b   :  { %v1790_v59 = vmul.f32 1.442695, %v1786_v55  ;;  %v1794_v56 = vmul.f32 1.442695, %v1788_v57 }
 0x36c   :  { %v1792_v60 = vmul.f32 1.442695, %v1787_v17  ;;  %v1796_v61 = vmul.f32 1.442695, %v1789_v58 }
 0x36d   :  { %2977 = vpow2.f32 %v1790_v59 }
 0x36e   :  { %2979 = vpow2.f32 %v1794_v56 }
 0x36f   :  { %2981 = vpow2.f32 %v1792_v60 }
 0x370   :  { %2983 = vpow2.f32 %v1796_v61 }
 0x377   :  { %v2978_v16 = vpop.eup %2977 }
 0x378   :  { %v2980_v19 = vpop.eup %2979  ;;  %v1798_v20 = vadd.f32 1.0, %v2978_v16 }
 0x379   :  { %v2982_v62 = vpop.eup %2981  ;;  %v1800_v0 = vadd.f32 1.0, %v2980_v19 }
 0x37a   :  { %v2984_v63 = vpop.eup %2983  ;;  %v1799_v1 = vadd.f32 1.0, %v2982_v62  ;;  %2985 = vrcp.f32 %v1798_v20 }
 0x37b   :  { %v1801_v2 = vadd.f32 1.0, %v2984_v63 }
 0x37c   :  { %2987 = vrcp.f32 %v1799_v1 }
 0x37d   :  { %2989 = vrcp.f32 %v1801_v2 }
 0x37e   :  { %2991 = vrcp.f32 %v1800_v0 }
 0x384   :  { %v2986_v3 = vpop.eup %2985 }
 0x386   :  { %v2988_v4 = vpop.eup %2987 }
 0x387   :  { %v2990_v5 = vpop.eup %2989  ;;  %1941 = vmatprep.mubr.f32.mxu0 %v2988_v4 }
 0x388   :  { %v2992_v6 = vpop.eup %2991  ;;  %2011 = vmatprep.mubr.f32.mxu1 %v2990_v5  ;;  %1942 = vmatmul.mubr.f32.vlgmr.msra.gmra.mrb[4].mxu0 %v2986_v3 }
 0x389   :  { %2012 = vmatmul.mubr.f32.vlgmr.msra.gmra.mrb[4].mxu1 %v2992_v6 }
 0x45b   :  { %v2058_v7 = vpop.f32.mrb[4].mxu0 }
 0x45c   :  { %v2093_v8 = vpop.f32.mrb[4].mxu1  ;;  %v2059_v9 = vpop.f32.mrb[5].mxu0 }
 0x45d   :  { %v2060_v11 = vadd.f32 %v2059_v9, %v2058_v7  ;;  %v2094_v12 = vpop.f32.mrb[5].mxu1 }
 0x45e   :  { %v2095_v13 = vadd.f32 %v2094_v12, %v2093_v8 }
 0x45f   :  { %v1944_v14 = vadd.f32 %v2060_v11, %v1876_v10 }
 0x461   :  { %v2014_v15 = vadd.f32 %v2095_v13, %v1944_v14 }
 0x463   :  { %2018 = vst.msk [vmem:[%s3452_s7] sm:$0xff] %vm2017_vm0, %v2014_v15 }
 0x464   :  { %2023 = vsyncpa [#allocation4], 1 }
 0x465   :  { %2024 = vsyncpa [#allocation6], 1 }
 0x466   :  { %2025 = vsyncpa [#allocation9], 1 }

</bundles_post_ra>
